<compile_context>
chip_gen: v7x
topology: tpu7x:2x2x1
jax: 0.10.0
libtpu: 0.0.40
codegen_flags: <defaults>
</compile_context>

<pallas_src>
import functools

import jax
import jax.numpy as jnp
from jax.experimental import pallas as pl
from jax.experimental.pallas import tpu as pltpu

LANE = 128  # TPU lane width


def _round_up(x, m):
    return ((x + m - 1) // m) * m


# ----------------------------- Fused Pallas kernel ------------------------- #
def fused_autoencoder_kernel(
    x_ref,
    w_enc1, b_enc1, w_enc2, b_enc2, w_enc3, b_enc3,
    w_dc, b_dc,                      # concatenated [dec1 | clf1] weights
    w_dec2, b_dec2, w_dec3, b_dec3,
    w_clf2, b_clf2,                  # clf2 padded so (decoded|clf) fills 128 lanes
    out_ref,                         # (TB, OUT_PAD): decoded | sigmoid(clf) | pad
    *, input_dim,
):
    """Entire Autoencoder forward for one batch tile, fully VMEM-resident."""

    def dense(x_bf16, w_ref, b_ref, relu):
        z = jnp.dot(x_bf16, w_ref[...], preferred_element_type=jnp.float32)
        z = z + b_ref[...]
        if relu:
            z = jnp.maximum(z, 0.0)
        return z  # f32 epilogue (v5e VPU has no bf16)

    x = x_ref[...].astype(jnp.bfloat16)

    # --- encoder: Linear+BN+ReLU, Linear+BN+ReLU, Linear+BN (enc padded to 128) ---
    h = dense(x, w_enc1, b_enc1, True).astype(jnp.bfloat16)
    h = dense(h, w_enc2, b_enc2, True).astype(jnp.bfloat16)
    encoded = dense(h, w_enc3, b_enc3, False).astype(jnp.bfloat16)   # (TB, ENC_PAD)

    # --- dec1 + clf1 fused: both consume `encoded`, both Linear+BN+ReLU ---
    dc = dense(encoded, w_dc, b_dc, True)           # (TB, 512) f32
    d = dc[:, :256].astype(jnp.bfloat16)            # decoder branch
    c = dc[:, 256:].astype(jnp.bfloat16)            # classifier branch

    # --- decoder tail ---
    d = dense(d, w_dec2, b_dec2, True).astype(jnp.bfloat16)
    z_dec = dense(d, w_dec3, b_dec3, False)         # (TB, input_dim) f32

    # --- classifier head ---
    z_clf = dense(c, w_clf2, b_clf2, False)         # (TB, OUT_PAD - input_dim) f32
    # sigmoid = 1 / (1 + exp(-z)): exp on the EUP, approx reciprocal off the VALU
    clf = pl.reciprocal(1.0 + jnp.exp(-z_clf), approx=True)

    # Single lane-dense output slab: decoded in lanes [0, input_dim),
    # clf probability in lane input_dim (remaining lanes are padding).
    out_ref[:, :input_dim] = z_dec.astype(out_ref.dtype)
    out_ref[:, input_dim:] = clf.astype(out_ref.dtype)


# ------------------------------- Wrapper ----------------------------------- #
def autoencoder_forward(kernel_params, x, *, input_dim, batch_tile=512):
    """x: (B, input_dim) f32. Returns (decoded (B, input_dim), clf (B, 1))."""
    B = x.shape[0]
    assert x.shape[1] == input_dim
    clf_cols = kernel_params[-1][0].shape[1]          # padded clf2 output width
    out_pad = input_dim + clf_cols                    # lane-dense output width

    # Batch tiling: multiple-of-8 tiles, big enough to amortize per-step
    # pipeline overhead; tiles are balanced so padding stays small.
    b_aligned = _round_up(max(B, 8), 8)
    if b_aligned <= batch_tile:
        n_tiles = 1
        TB = b_aligned
    else:
        n_tiles = pl.cdiv(b_aligned, batch_tile)
        TB = _round_up(pl.cdiv(b_aligned, n_tiles), 8)
    B_pad = n_tiles * TB
    if B_pad != B:
        x = jnp.pad(x, ((0, B_pad - B), (0, 0)))

    flat = []
    in_specs = [pl.BlockSpec((TB, input_dim), lambda i: (i, 0))]
    for w, b in kernel_params:
        flat.extend([w, b])
        # Weights/biases: full-array blocks with a constant block index
        # -> stay resident in VMEM across batch tiles (no re-DMA).
        in_specs.append(pl.BlockSpec(w.shape, lambda i: (0, 0)))
        in_specs.append(pl.BlockSpec(b.shape, lambda i: (0, 0)))

    out_shape = jax.ShapeDtypeStruct((B_pad, out_pad), jnp.float32)
    out_specs = pl.BlockSpec((TB, out_pad), lambda i: (i, 0))

    kernel = functools.partial(fused_autoencoder_kernel, input_dim=input_dim)

    out = pl.pallas_call(
        kernel,
        out_shape=out_shape,
        grid_spec=pltpu.PrefetchScalarGridSpec(
            num_scalar_prefetch=0,
            grid=(n_tiles,),
            in_specs=in_specs,
            out_specs=out_specs,
        ),
        compiler_params=pltpu.CompilerParams(
            dimension_semantics=("parallel",),
            vmem_limit_bytes=48 * 1024 * 1024,
        ),
    )(x, *flat)

    decoded = out[:B, :input_dim]
    clf = out[:B, input_dim:input_dim + 1]
    return decoded, clf


# --------------------------- Parameter helpers ------------------------------ #
def init_linear(key, in_dim, out_dim):
    """PyTorch-like init: U(-1/sqrt(in_dim), 1/sqrt(in_dim)); W stored [in, out]."""
    kw, kb = jax.random.split(key)
    bound = 1.0 / jnp.sqrt(jnp.float32(in_dim))
    w = jax.random.uniform(kw, (in_dim, out_dim), jnp.float32, -bound, bound)
    b = jax.random.uniform(kb, (1, out_dim), jnp.float32, -bound, bound)
    return w, b


def bn_scale_shift(key, out_dim, eps=1e-5):
    """Eval-mode BatchNorm1d with NON-trivial running stats, as scale/shift."""
    kg, kb, km, kv = jax.random.split(key, 4)
    gamma = jax.random.uniform(kg, (1, out_dim), jnp.float32, 0.8, 1.2)
    beta = jax.random.uniform(kb, (1, out_dim), jnp.float32, -0.1, 0.1)
    mean = jax.random.uniform(km, (1, out_dim), jnp.float32, -0.1, 0.1)
    var = jax.random.uniform(kv, (1, out_dim), jnp.float32, 0.8, 1.2)
    scale = gamma * jax.lax.rsqrt(var + eps)
    shift = beta - mean * scale
    return scale, shift


def init_autoencoder_folded(key, input_dim, encoding_dim):
    """Per-layer (W, b) with BatchNorm folded in, f32 (reference precision)."""
    keys = jax.random.split(key, 16)

    def layer(k_lin, k_bn, in_d, out_d, bn=True):
        w, b = init_linear(k_lin, in_d, out_d)
        if bn:
            scale, shift = bn_scale_shift(k_bn, out_d)
            w, b = w * scale, b * scale + shift
        return w, b

    return {
        "enc1": layer(keys[0], keys[1], input_dim, 512),
        "enc2": layer(keys[2], keys[3], 512, 256),
        "enc3": layer(keys[4], keys[5], 256, encoding_dim),
        "clf1": layer(keys[6], keys[7], encoding_dim, 256),
        "clf2": layer(keys[8], keys[9], 256, 1, bn=False),
        "dec1": layer(keys[10], keys[11], encoding_dim, 256),
        "dec2": layer(keys[12], keys[13], 256, 512),
        "dec3": layer(keys[14], keys[15], 512, input_dim, bn=False),
    }


def build_kernel_params(folded, *, input_dim, encoding_dim):
    """bf16 weights / f32 biases; encoding lane-padded; dec1|clf1 concatenated;
    clf2 padded so that (decoded | clf) packs into a lane-dense output slab."""
    enc_pad = _round_up(max(encoding_dim, 1), LANE)
    out_pad = _round_up(input_dim + 1, LANE)
    clf_cols = out_pad - input_dim

    def wb(name):
        w, b = folded[name]
        return w.astype(jnp.bfloat16), b.astype(jnp.float32)

    # enc3: zero-pad output columns so `encoded` is lane-dense (padded cols == 0).
    w_enc3, b_enc3 = folded["enc3"]
    w_enc3 = jnp.pad(w_enc3, ((0, 0), (0, enc_pad - encoding_dim))).astype(jnp.bfloat16)
    b_enc3 = jnp.pad(b_enc3, ((0, 0), (0, enc_pad - encoding_dim))).astype(jnp.float32)

    # dec1 | clf1 fused (both consume `encoded`); zero-pad input rows to enc_pad.
    w_dc = jnp.concatenate([folded["dec1"][0], folded["clf1"][0]], axis=1)
    w_dc = jnp.pad(w_dc, ((0, enc_pad - encoding_dim), (0, 0))).astype(jnp.bfloat16)
    b_dc = jnp.concatenate([folded["dec1"][1], folded["clf1"][1]], axis=1).astype(jnp.float32)

    # clf2: pad the 1-wide head to fill the lanes after `decoded` in the out slab.
    w_clf2, b_clf2 = folded["clf2"]
    w_clf2 = jnp.pad(w_clf2, ((0, 0), (0, clf_cols - 1))).astype(jnp.bfloat16)
    b_clf2 = jnp.pad(b_clf2, ((0, 0), (0, clf_cols - 1))).astype(jnp.float32)

    return [
        wb("enc1"), wb("enc2"), (w_enc3, b_enc3),
        (w_dc, b_dc),
        wb("dec2"), wb("dec3"),
        (w_clf2, b_clf2),
    ]


# ----------------------- Pure-JAX reference (same math) --------------------- #
def reference_forward(folded, x):
    def dense(x, name, relu=False):
        w, b = folded[name]
        xq = x.astype(jnp.bfloat16).astype(jnp.float32)   # mirror kernel's bf16 inputs
        wq = w.astype(jnp.bfloat16).astype(jnp.float32)
        z = xq @ wq + b
        return jnp.maximum(z, 0.0) if relu else z

    h = dense(x, "enc1", True)
    h = dense(h, "enc2", True)
    enc = dense(h, "enc3")
    d = dense(enc, "dec1", True)
    d = dense(d, "dec2", True)
    dec = dense(d, "dec3")
    c = dense(enc, "clf1", True)
    clf = jax.nn.sigmoid(dense(c, "clf2"))
    return dec, clf


if __name__ == "__main__":
    INPUT_DIM = 64
    ENCODING_DIM = 32
    BATCH = 8

    key = jax.random.PRNGKey(0)
    k_params, k_x = jax.random.split(key)
    folded = init_autoencoder_folded(k_params, INPUT_DIM, ENCODING_DIM)
    kernel_params = build_kernel_params(
        folded, input_dim=INPUT_DIM, encoding_dim=ENCODING_DIM)
    x = jax.random.normal(k_x, (BATCH, INPUT_DIM), jnp.float32)

    decoded, clf_out = autoencoder_forward(kernel_params, x, input_dim=INPUT_DIM)
    decoded = jax.block_until_ready(decoded)
    clf_out = jax.block_until_ready(clf_out)

    # Sanity check against pure-JAX reference (same folded params / bf16 math,
    # now with non-trivial BatchNorm running statistics folded in).
    ref_dec, ref_clf = reference_forward(folded, x)
    assert decoded.shape == (BATCH, INPUT_DIM)
    assert clf_out.shape == (BATCH, 1)
    assert jnp.allclose(decoded, ref_dec, atol=1e-2, rtol=1e-2), \
        float(jnp.max(jnp.abs(decoded - ref_dec)))
    assert jnp.allclose(clf_out, ref_clf, atol=1e-2, rtol=1e-2), \
        float(jnp.max(jnp.abs(clf_out - ref_clf)))

    print("KERNEL_OK")
</pallas_src>

<mosaic_0001>
module attributes {stable_mosaic.version = 11 : i64} {
  func.func @fused_autoencoder_kernel(%arg0: i32, %arg1: memref<8x64xf32, #tpu.memory_space<vmem>>, %arg2: memref<64x512xbf16, #tpu.memory_space<vmem>>, %arg3: memref<1x512xf32, #tpu.memory_space<vmem>>, %arg4: memref<512x256xbf16, #tpu.memory_space<vmem>>, %arg5: memref<1x256xf32, #tpu.memory_space<vmem>>, %arg6: memref<256x128xbf16, #tpu.memory_space<vmem>>, %arg7: memref<1x128xf32, #tpu.memory_space<vmem>>, %arg8: memref<128x512xbf16, #tpu.memory_space<vmem>>, %arg9: memref<1x512xf32, #tpu.memory_space<vmem>>, %arg10: memref<256x512xbf16, #tpu.memory_space<vmem>>, %arg11: memref<1x512xf32, #tpu.memory_space<vmem>>, %arg12: memref<512x64xbf16, #tpu.memory_space<vmem>>, %arg13: memref<1x64xf32, #tpu.memory_space<vmem>>, %arg14: memref<256x64xbf16, #tpu.memory_space<vmem>>, %arg15: memref<1x64xf32, #tpu.memory_space<vmem>>, %arg16: memref<8x128xf32, #tpu.memory_space<vmem>>) attributes {dimension_semantics = [#tpu.dimension_semantics<parallel>], iteration_bounds = array<i64: 1>, scalar_prefetch = 0 : i64, scratch_operands = 0 : i64, tpu.core_type = #tpu.core_type<tc>, window_params = [{transform_indices = @transform_0, window_bounds = array<i64: 8, 64>}, {pipeline_mode = #tpu.pipeline_mode<synchronous>, transform_indices = @transform_1, window_bounds = array<i64: 64, 512>}, {pipeline_mode = #tpu.pipeline_mode<synchronous>, transform_indices = @transform_2, window_bounds = array<i64: 1, 512>}, {pipeline_mode = #tpu.pipeline_mode<synchronous>, transform_indices = @transform_3, window_bounds = array<i64: 512, 256>}, {pipeline_mode = #tpu.pipeline_mode<synchronous>, transform_indices = @transform_4, window_bounds = array<i64: 1, 256>}, {pipeline_mode = #tpu.pipeline_mode<synchronous>, transform_indices = @transform_5, window_bounds = array<i64: 256, 128>}, {pipeline_mode = #tpu.pipeline_mode<synchronous>, transform_indices = @transform_6, window_bounds = array<i64: 1, 128>}, {pipeline_mode = #tpu.pipeline_mode<synchronous>, transform_indices = @transform_7, window_bounds = array<i64: 128, 512>}, {pipeline_mode = #tpu.pipeline_mode<synchronous>, transform_indices = @transform_8, window_bounds = array<i64: 1, 512>}, {pipeline_mode = #tpu.pipeline_mode<synchronous>, transform_indices = @transform_9, window_bounds = array<i64: 256, 512>}, {pipeline_mode = #tpu.pipeline_mode<synchronous>, transform_indices = @transform_10, window_bounds = array<i64: 1, 512>}, {pipeline_mode = #tpu.pipeline_mode<synchronous>, transform_indices = @transform_11, window_bounds = array<i64: 512, 64>}, {pipeline_mode = #tpu.pipeline_mode<synchronous>, transform_indices = @transform_12, window_bounds = array<i64: 1, 64>}, {pipeline_mode = #tpu.pipeline_mode<synchronous>, transform_indices = @transform_13, window_bounds = array<i64: 256, 64>}, {pipeline_mode = #tpu.pipeline_mode<synchronous>, transform_indices = @transform_14, window_bounds = array<i64: 1, 64>}, {transform_indices = @transform_15, window_bounds = array<i64: 8, 128>}]} {
    %c0 = arith.constant 0 : index
    %c0_0 = arith.constant 0 : index
    %0 = vector.load %arg1[%c0, %c0_0] : memref<8x64xf32, #tpu.memory_space<vmem>>, vector<8x64xf32>
    %1 = arith.truncf %0 : vector<8x64xf32> to vector<8x64xbf16>
    %c0_1 = arith.constant 0 : index
    %c0_2 = arith.constant 0 : index
    %2 = vector.load %arg2[%c0_1, %c0_2] : memref<64x512xbf16, #tpu.memory_space<vmem>>, vector<64x512xbf16>
    %cst = arith.constant dense<0.000000e+00> : vector<8x512xf32>
    %3 = tpu.matmul %1, %2, %cst {dimension_numbers = #tpu.dot_dimension_numbers<[1], [0], [0], [1], [0, 0, 1, 1], [], []>} : vector<8x64xbf16>, vector<64x512xbf16>, vector<8x512xf32> -> vector<8x512xf32>
    %c0_3 = arith.constant 0 : index
    %c0_4 = arith.constant 0 : index
    %4 = vector.load %arg3[%c0_3, %c0_4] : memref<1x512xf32, #tpu.memory_space<vmem>>, vector<1x512xf32>
    %5 = vector.broadcast %4 : vector<1x512xf32> to vector<8x512xf32>
    %6 = arith.addf %3, %5 : vector<8x512xf32>
    %cst_5 = arith.constant 0.000000e+00 : f32
    %7 = vector.broadcast %cst_5 : f32 to vector<8x512xf32>
    %8 = arith.maximumf %6, %7 : vector<8x512xf32>
    %9 = arith.truncf %8 : vector<8x512xf32> to vector<8x512xbf16>
    %c0_6 = arith.constant 0 : index
    %c0_7 = arith.constant 0 : index
    %10 = vector.load %arg4[%c0_6, %c0_7] : memref<512x256xbf16, #tpu.memory_space<vmem>>, vector<512x256xbf16>
    %cst_8 = arith.constant dense<0.000000e+00> : vector<8x256xf32>
    %11 = tpu.matmul %9, %10, %cst_8 {dimension_numbers = #tpu.dot_dimension_numbers<[1], [0], [0], [1], [0, 0, 1, 1], [], []>} : vector<8x512xbf16>, vector<512x256xbf16>, vector<8x256xf32> -> vector<8x256xf32>
    %c0_9 = arith.constant 0 : index
    %c0_10 = arith.constant 0 : index
    %12 = vector.load %arg5[%c0_9, %c0_10] : memref<1x256xf32, #tpu.memory_space<vmem>>, vector<1x256xf32>
    %13 = vector.broadcast %12 : vector<1x256xf32> to vector<8x256xf32>
    %14 = arith.addf %11, %13 : vector<8x256xf32>
    %cst_11 = arith.constant 0.000000e+00 : f32
    %15 = vector.broadcast %cst_11 : f32 to vector<8x256xf32>
    %16 = arith.maximumf %14, %15 : vector<8x256xf32>
    %17 = arith.truncf %16 : vector<8x256xf32> to vector<8x256xbf16>
    %c0_12 = arith.constant 0 : index
    %c0_13 = arith.constant 0 : index
    %18 = vector.load %arg6[%c0_12, %c0_13] : memref<256x128xbf16, #tpu.memory_space<vmem>>, vector<256x128xbf16>
    %cst_14 = arith.constant dense<0.000000e+00> : vector<8x128xf32>
    %19 = tpu.matmul %17, %18, %cst_14 {dimension_numbers = #tpu.dot_dimension_numbers<[1], [0], [0], [1], [0, 0, 1, 1], [], []>} : vector<8x256xbf16>, vector<256x128xbf16>, vector<8x128xf32> -> vector<8x128xf32>
    %c0_15 = arith.constant 0 : index
    %c0_16 = arith.constant 0 : index
    %20 = vector.load %arg7[%c0_15, %c0_16] : memref<1x128xf32, #tpu.memory_space<vmem>>, vector<1x128xf32>
    %21 = vector.broadcast %20 : vector<1x128xf32> to vector<8x128xf32>
    %22 = arith.addf %19, %21 : vector<8x128xf32>
    %23 = arith.truncf %22 : vector<8x128xf32> to vector<8x128xbf16>
    %c0_17 = arith.constant 0 : index
    %c0_18 = arith.constant 0 : index
    %24 = vector.load %arg8[%c0_17, %c0_18] : memref<128x512xbf16, #tpu.memory_space<vmem>>, vector<128x512xbf16>
    %cst_19 = arith.constant dense<0.000000e+00> : vector<8x512xf32>
    %25 = tpu.matmul %23, %24, %cst_19 {dimension_numbers = #tpu.dot_dimension_numbers<[1], [0], [0], [1], [0, 0, 1, 1], [], []>} : vector<8x128xbf16>, vector<128x512xbf16>, vector<8x512xf32> -> vector<8x512xf32>
    %c0_20 = arith.constant 0 : index
    %c0_21 = arith.constant 0 : index
    %26 = vector.load %arg9[%c0_20, %c0_21] : memref<1x512xf32, #tpu.memory_space<vmem>>, vector<1x512xf32>
    %27 = vector.broadcast %26 : vector<1x512xf32> to vector<8x512xf32>
    %28 = arith.addf %25, %27 : vector<8x512xf32>
    %cst_22 = arith.constant 0.000000e+00 : f32
    %29 = vector.broadcast %cst_22 : f32 to vector<8x512xf32>
    %30 = arith.maximumf %28, %29 : vector<8x512xf32>
    %31 = vector.extract_strided_slice %30 {offsets = [0, 0], sizes = [8, 256], strides = [1, 1]} : vector<8x512xf32> to vector<8x256xf32>
    %32 = arith.truncf %31 : vector<8x256xf32> to vector<8x256xbf16>
    %33 = vector.extract_strided_slice %30 {offsets = [0, 256], sizes = [8, 256], strides = [1, 1]} : vector<8x512xf32> to vector<8x256xf32>
    %34 = arith.truncf %33 : vector<8x256xf32> to vector<8x256xbf16>
    %c0_23 = arith.constant 0 : index
    %c0_24 = arith.constant 0 : index
    %35 = vector.load %arg10[%c0_23, %c0_24] : memref<256x512xbf16, #tpu.memory_space<vmem>>, vector<256x512xbf16>
    %cst_25 = arith.constant dense<0.000000e+00> : vector<8x512xf32>
    %36 = tpu.matmul %32, %35, %cst_25 {dimension_numbers = #tpu.dot_dimension_numbers<[1], [0], [0], [1], [0, 0, 1, 1], [], []>} : vector<8x256xbf16>, vector<256x512xbf16>, vector<8x512xf32> -> vector<8x512xf32>
    %c0_26 = arith.constant 0 : index
    %c0_27 = arith.constant 0 : index
    %37 = vector.load %arg11[%c0_26, %c0_27] : memref<1x512xf32, #tpu.memory_space<vmem>>, vector<1x512xf32>
    %38 = vector.broadcast %37 : vector<1x512xf32> to vector<8x512xf32>
    %39 = arith.addf %36, %38 : vector<8x512xf32>
    %cst_28 = arith.constant 0.000000e+00 : f32
    %40 = vector.broadcast %cst_28 : f32 to vector<8x512xf32>
    %41 = arith.maximumf %39, %40 : vector<8x512xf32>
    %42 = arith.truncf %41 : vector<8x512xf32> to vector<8x512xbf16>
    %c0_29 = arith.constant 0 : index
    %c0_30 = arith.constant 0 : index
    %43 = vector.load %arg12[%c0_29, %c0_30] : memref<512x64xbf16, #tpu.memory_space<vmem>>, vector<512x64xbf16>
    %cst_31 = arith.constant dense<0.000000e+00> : vector<8x64xf32>
    %44 = tpu.matmul %42, %43, %cst_31 {dimension_numbers = #tpu.dot_dimension_numbers<[1], [0], [0], [1], [0, 0, 1, 1], [], []>} : vector<8x512xbf16>, vector<512x64xbf16>, vector<8x64xf32> -> vector<8x64xf32>
    %c0_32 = arith.constant 0 : index
    %c0_33 = arith.constant 0 : index
    %45 = vector.load %arg13[%c0_32, %c0_33] : memref<1x64xf32, #tpu.memory_space<vmem>>, vector<1x64xf32>
    %46 = vector.broadcast %45 : vector<1x64xf32> to vector<8x64xf32>
    %47 = arith.addf %44, %46 : vector<8x64xf32>
    %c0_34 = arith.constant 0 : index
    %c0_35 = arith.constant 0 : index
    %48 = vector.load %arg14[%c0_34, %c0_35] : memref<256x64xbf16, #tpu.memory_space<vmem>>, vector<256x64xbf16>
    %cst_36 = arith.constant dense<0.000000e+00> : vector<8x64xf32>
    %49 = tpu.matmul %34, %48, %cst_36 {dimension_numbers = #tpu.dot_dimension_numbers<[1], [0], [0], [1], [0, 0, 1, 1], [], []>} : vector<8x256xbf16>, vector<256x64xbf16>, vector<8x64xf32> -> vector<8x64xf32>
    %c0_37 = arith.constant 0 : index
    %c0_38 = arith.constant 0 : index
    %50 = vector.load %arg15[%c0_37, %c0_38] : memref<1x64xf32, #tpu.memory_space<vmem>>, vector<1x64xf32>
    %51 = vector.broadcast %50 : vector<1x64xf32> to vector<8x64xf32>
    %52 = arith.addf %49, %51 : vector<8x64xf32>
    %cst_39 = arith.constant 0.000000e+00 : f32
    %53 = vector.broadcast %cst_39 : f32 to vector<8x64xf32>
    %54 = arith.subf %53, %52 : vector<8x64xf32>
    %55 = math.exp %54 : vector<8x64xf32>
    %cst_40 = arith.constant 1.000000e+00 : f32
    %56 = vector.broadcast %cst_40 : f32 to vector<8x64xf32>
    %57 = arith.addf %56, %55 : vector<8x64xf32>
    %58 = tpu.reciprocal %57 {approx = true} : vector<8x64xf32> -> vector<8x64xf32>
    %c0_41 = arith.constant 0 : index
    %c0_42 = arith.constant 0 : index
    %59 = vector.load %arg16[%c0_41, %c0_42] : memref<8x128xf32, #tpu.memory_space<vmem>>, vector<8x64xf32>
    tpu.vector_store %arg16[%c0_41, %c0_42], %47 {strides = array<i32>} : memref<8x128xf32, #tpu.memory_space<vmem>>, vector<8x64xf32>,
    %c0_43 = arith.constant 0 : index
    %c64 = arith.constant 64 : index
    %60 = vector.load %arg16[%c0_43, %c64] : memref<8x128xf32, #tpu.memory_space<vmem>>, vector<8x64xf32>
    tpu.vector_store %arg16[%c0_43, %c64], %58 {strides = array<i32>} : memref<8x128xf32, #tpu.memory_space<vmem>>, vector<8x64xf32>,
    return
  }
  func.func @transform_0(%arg0: i32) -> (i32, i32) {
    %c0_i32 = arith.constant 0 : i32
    %c0_i32_0 = arith.constant 0 : i32
    return %arg0, %c0_i32 : i32, i32
  }
  func.func @transform_1(%arg0: i32) -> (i32, i32) {
    %c0_i32 = arith.constant 0 : i32
    %c0_i32_0 = arith.constant 0 : i32
    %c0_i32_1 = arith.constant 0 : i32
    return %c0_i32, %c0_i32_0 : i32, i32
  }
  func.func @transform_2(%arg0: i32) -> (i32, i32) {
    %c0_i32 = arith.constant 0 : i32
    %c0_i32_0 = arith.constant 0 : i32
    %c0_i32_1 = arith.constant 0 : i32
    return %c0_i32, %c0_i32_0 : i32, i32
  }
  func.func @transform_3(%arg0: i32) -> (i32, i32) {
    %c0_i32 = arith.constant 0 : i32
    %c0_i32_0 = arith.constant 0 : i32
    %c0_i32_1 = arith.constant 0 : i32
    return %c0_i32, %c0_i32_0 : i32, i32
  }
  func.func @transform_4(%arg0: i32) -> (i32, i32) {
    %c0_i32 = arith.constant 0 : i32
    %c0_i32_0 = arith.constant 0 : i32
    %c0_i32_1 = arith.constant 0 : i32
    return %c0_i32, %c0_i32_0 : i32, i32
  }
  func.func @transform_5(%arg0: i32) -> (i32, i32) {
    %c0_i32 = arith.constant 0 : i32
    %c0_i32_0 = arith.constant 0 : i32
    %c0_i32_1 = arith.constant 0 : i32
    return %c0_i32, %c0_i32_0 : i32, i32
  }
  func.func @transform_6(%arg0: i32) -> (i32, i32) {
    %c0_i32 = arith.constant 0 : i32
    %c0_i32_0 = arith.constant 0 : i32
    %c0_i32_1 = arith.constant 0 : i32
    return %c0_i32, %c0_i32_0 : i32, i32
  }
  func.func @transform_7(%arg0: i32) -> (i32, i32) {
    %c0_i32 = arith.constant 0 : i32
    %c0_i32_0 = arith.constant 0 : i32
    %c0_i32_1 = arith.constant 0 : i32
    return %c0_i32, %c0_i32_0 : i32, i32
  }
  func.func @transform_8(%arg0: i32) -> (i32, i32) {
    %c0_i32 = arith.constant 0 : i32
    %c0_i32_0 = arith.constant 0 : i32
    %c0_i32_1 = arith.constant 0 : i32
    return %c0_i32, %c0_i32_0 : i32, i32
  }
  func.func @transform_9(%arg0: i32) -> (i32, i32) {
    %c0_i32 = arith.constant 0 : i32
    %c0_i32_0 = arith.constant 0 : i32
    %c0_i32_1 = arith.constant 0 : i32
    return %c0_i32, %c0_i32_0 : i32, i32
  }
  func.func @transform_10(%arg0: i32) -> (i32, i32) {
    %c0_i32 = arith.constant 0 : i32
    %c0_i32_0 = arith.constant 0 : i32
    %c0_i32_1 = arith.constant 0 : i32
    return %c0_i32, %c0_i32_0 : i32, i32
  }
  func.func @transform_11(%arg0: i32) -> (i32, i32) {
    %c0_i32 = arith.constant 0 : i32
    %c0_i32_0 = arith.constant 0 : i32
    %c0_i32_1 = arith.constant 0 : i32
    return %c0_i32, %c0_i32_0 : i32, i32
  }
  func.func @transform_12(%arg0: i32) -> (i32, i32) {
    %c0_i32 = arith.constant 0 : i32
    %c0_i32_0 = arith.constant 0 : i32
    %c0_i32_1 = arith.constant 0 : i32
    return %c0_i32, %c0_i32_0 : i32, i32
  }
  func.func @transform_13(%arg0: i32) -> (i32, i32) {
    %c0_i32 = arith.constant 0 : i32
    %c0_i32_0 = arith.constant 0 : i32
    %c0_i32_1 = arith.constant 0 : i32
    return %c0_i32, %c0_i32_0 : i32, i32
  }
  func.func @transform_14(%arg0: i32) -> (i32, i32) {
    %c0_i32 = arith.constant 0 : i32
    %c0_i32_0 = arith.constant 0 : i32
    %c0_i32_1 = arith.constant 0 : i32
    return %c0_i32, %c0_i32_0 : i32, i32
  }
  func.func @transform_15(%arg0: i32) -> (i32, i32) {
    %c0_i32 = arith.constant 0 : i32
    %c0_i32_0 = arith.constant 0 : i32
    return %arg0, %c0_i32 : i32, i32
  }
}

</mosaic_0001>

<bundles_post_ra>
// kernel: tpu_custom_call.1
= control target key start
LH: loop header
LB: loop body
LE: loop exit
PB: predicated region body
PF: predicated region fallthrough
CT: control target
= control target key end

     0   :  { %20 = vsyncpa [#allocation3], 0  ;;  %s3707_s0 = inlined_call_operand.vmem [shape: f32[8,64], index: 0, kind: input, shape index: {}]   ;;  %s3708_s1 = inlined_call_operand.hbm [shape: bf16[64,512], index: 1, kind: input, shape index: {}]   ;;  %s3709_s2 = inlined_call_operand.vmem [shape: f32[1,512], index: 2, kind: input, shape index: {}]   ;;  %s3710_s3 = inlined_call_operand.vmem [shape: bf16[512,256], index: 3, kind: input, shape index: {}]   ;;  %s3711_s4 = inlined_call_operand.vmem [shape: f32[1,256], index: 4, kind: input, shape index: {}]   ;;  %s3712_s5 = inlined_call_operand.hbm [shape: bf16[256,128], index: 5, kind: input, shape index: {}]   ;;  %s3713_s6 = inlined_call_operand.vmem [shape: f32[1,128], index: 6, kind: input, shape index: {}]   ;;  %s3714_s7 = inlined_call_operand.hbm [shape: bf16[128,512], index: 7, kind: input, shape index: {}]   ;;  %s3715_s8 = inlined_call_operand.vmem [shape: f32[1,512], index: 8, kind: input, shape index: {}]   ;;  %s3716_s9 = inlined_call_operand.hbm [shape: bf16[256,512], index: 9, kind: input, shape index: {}]   ;;  %s3717_s10 = inlined_call_operand.vmem [shape: f32[1,512], index: 10, kind: input, shape index: {}]   ;;  %s3718_s11 = inlined_call_operand.vmem [shape: bf16[512,64], index: 11, kind: input, shape index: {}]   ;;  %s3719_s12 = inlined_call_operand.vmem [shape: f32[1,64], index: 12, kind: input, shape index: {}]   ;;  %s3720_s13 = inlined_call_operand.vmem [shape: bf16[256,64], index: 13, kind: input, shape index: {}]   ;;  %s3721_s14 = inlined_call_operand.vmem [shape: f32[1,64], index: 14, kind: input, shape index: {}]   ;;  %s3722_s15 = inlined_call_operand.hbm [shape: f32[8,128], index: 15, kind: output, shape index: {}]  }
   0x1   :  { %21 = vsyncpa [#allocation6], 0 }
   0x2   :  { %22 = vsyncpa [#allocation9], 0 }
   0x3   :  { %23 = vsyncpa [#allocation4], 0  ;;  %s3125_s18 = smov [#allocation5]   ;;  %s3007_s22 = scalar_lea.hbm %s3712_s5, 2048 }
   0x4   :  { %s49_s19 = sshll.u32 %s3125_s18, 4  ;;  %p3008_p0 = scmp.ne.s32.totalorder %s3712_s5, %s3007_s22  ;;  %s50_s19 = int_to_ptr.vmem [resolvable:$true] %s49_s19 }
   0x5   :  { %p3011_p1 = scmp.lt.u32.totalorder %s3007_s22, %s3712_s5 }
   0x7   :  { %p3013_p2 = pnand %p3011_p1, %p3008_p0 }
   0x9   :  { %3016 = shalt.err (!%p3013_p2)
}
   0xa   :  { %s3017_s27 = scalar_lea.vmem %s50_s19, 2048  ;;  %p3022_p4 = scmp.lt.s32.totalorder %s50_s19, %s50_s19 }
   0xb   :  { %p3018_p3 = scmp.ne.s32.totalorder %s50_s19, %s3017_s27  ;;  %p3023_p5 = scmp.lt.s32.totalorder %s3017_s27, %s3017_s27 }
   0xd   :  { %p3024_p6 = por %p3023_p5, %p3022_p4 }
   0xf   :  { %p3025_p7 = pnand %p3024_p6, %p3018_p3 }
  0x11   :  { %3028 = shalt.err (!%p3025_p7)
}
  0x12   :  { %s3723_s28 = smov 64   ;;  %s3127_s29 = smov 4  }
  0x13   :  { %55 = dma.hbm_to_vmem [thread:$0]  %s3712_s5, 2048, %s50_s19, [#allocation6], %s3723_s28, %s3723_s28, %s3127_s29  }
  0x14   :  { %s3128_s17 = smov [#allocation2]   ;;  %s3029_s22 = scalar_lea.hbm %s3708_s1, 2048 }
  0x15   :  { %s31_s18 = sshll.u32 %s3128_s17, 4  ;;  %p3030_p8 = scmp.ne.s32.totalorder %s3708_s1, %s3029_s22  ;;  %s32_s18 = int_to_ptr.vmem [resolvable:$true] %s31_s18 }
  0x16   :  { %p3033_p9 = scmp.lt.u32.totalorder %s3029_s22, %s3708_s1 }
  0x18   :  { %p3035_p10 = pnand %p3033_p9, %p3030_p8 }
  0x1a   :  { %3038 = shalt.err (!%p3035_p10)
}
  0x1b   :  { %s3039_s27 = scalar_lea.vmem %s32_s18, 2048  ;;  %p3044_p12 = scmp.lt.s32.totalorder %s32_s18, %s32_s18 }
  0x1c   :  { %p3040_p11 = scmp.ne.s32.totalorder %s32_s18, %s3039_s27  ;;  %p3045_p13 = scmp.lt.s32.totalorder %s3039_s27, %s3039_s27 }
  0x1e   :  { %p3046_p0 = por %p3045_p13, %p3044_p12 }
  0x20   :  { %p3047_p1 = pnand %p3046_p0, %p3040_p11 }
  0x22   :  { %3050 = shalt.err (!%p3047_p1)
}
  0x23   :  { %s3129_s5 = smov 256   ;;  %s3130_s19 = smov 16  }
  0x24   :  { %37 = dma.hbm_to_vmem [thread:$0]  %s3708_s1, 2048, %s32_s18, [#allocation3], %s3129_s5, %s3129_s5, %s3130_s19  }
  0x25   :  { %s3131_s16 = smov [#allocation7]   ;;  %s3132_s20 = smov [#allocation8]  }
  0x26   :  { %s63_s17 = sshll.u32 %s3131_s16, 4  ;;  %s77_s21 = sshll.u32 %s3132_s20, 4  ;;  %s64_s17 = int_to_ptr.vmem [resolvable:$true] %s63_s17  ;;  %s3244_s21 = int_to_ptr.vmem [resolvable:$true] %s77_s21 }
  0x27   :  { %s3051_s24 = scalar_lea.hbm %s3714_s7, 4096 }
  0x28   :  { %p3052_p2 = scmp.ne.s32.totalorder %s3714_s7, %s3051_s24  ;;  %p3055_p3 = scmp.lt.u32.totalorder %s3051_s24, %s3714_s7 }
  0x2a   :  { %p3057_p4 = pnand %p3055_p3, %p3052_p2 }
  0x2c   :  { %3060 = shalt.err (!%p3057_p4)
}
  0x2d   :  { %s3061_s1 = scalar_lea.vmem %s64_s17, 4096  ;;  %p3066_p6 = scmp.lt.s32.totalorder %s64_s17, %s64_s17 }
  0x2e   :  { %p3062_p5 = scmp.ne.s32.totalorder %s64_s17, %s3061_s1  ;;  %p3067_p7 = scmp.lt.s32.totalorder %s3061_s1, %s3061_s1 }
  0x30   :  { %p3068_p8 = por %p3067_p7, %p3066_p6 }
  0x32   :  { %p3069_p9 = pnand %p3068_p8, %p3062_p5 }
  0x34   :  { %3072 = shalt.err (!%p3069_p9)
}
  0x35   :  { %69 = dma.hbm_to_vmem [thread:$0]  %s3714_s7, 4096, %s64_s17, [#allocation6], %s3129_s5, %s3129_s5, %s3130_s19  }
  0x36   :  { %s3073_s28 = scalar_lea.hbm %s3716_s9, 8192 }
  0x37   :  { %p3074_p10 = scmp.ne.s32.totalorder %s3716_s9, %s3073_s28  ;;  %p3077_p11 = scmp.lt.u32.totalorder %s3073_s28, %s3716_s9 }
  0x39   :  { %p3079_p12 = pnand %p3077_p11, %p3074_p10 }
  0x3b   :  { %3082 = shalt.err (!%p3079_p12)
}
  0x3c   :  { %s3083_s25 = scalar_lea.vmem %s3244_s21, 8192  ;;  %p3088_p0 = scmp.lt.s32.totalorder %s3244_s21, %s3244_s21 }
  0x3d   :  { %p3084_p13 = scmp.ne.s32.totalorder %s3244_s21, %s3083_s25  ;;  %p3089_p1 = scmp.lt.s32.totalorder %s3083_s25, %s3083_s25 }
  0x3f   :  { %p3090_p2 = por %p3089_p1, %p3088_p0 }
  0x41   :  { %p3091_p3 = pnand %p3090_p2, %p3084_p13 }
  0x43   :  { %3094 = shalt.err (!%p3091_p3)
}
  0x44   :  { %83 = dma.hbm_to_vmem [thread:$0]  %s3716_s9, 8192, %s3244_s21, [#allocation9], %s3129_s5, %s3129_s5, %s3130_s19  }
  0x45   :  { %3117 = dma.done.wait [#allocation3], 2048  }
  0x46   :  { %3118 = vsyncadd [#allocation3], 4294965248 }
  0x47   :  { %3119 = dma.done.wait [#allocation6], 6144  }
  0x48   :  { %3120 = vsyncadd [#allocation6], 4294961152 }
  0x49   :  { %3121 = dma.done.wait [#allocation9], 8192  }
  0x4a   :  { %3122 = vsyncadd [#allocation9], 4294959104  ;;  %v3133_v0 = vmov 0   ;;  %v2675_v1 = vld [vmem:[#allocation2 + $0x4] ss:$16 sps:$4 sm:$0xff]   ;;  %vm227_vm0 = vcmask 523264  }
  0x4b   :  { %263 = vmatprep.mubr.bf16.mxu0 %v3133_v0  ;;  %304 = vmatprep.mubr.bf16.mxu1 %v3133_v0  ;;  %v2677_v2 = vld [vmem:[#allocation2] ss:$16 sps:$4 sm:$0xff]   ;;  %v2678_v3 = vld [vmem:[#allocation2 + $0x24] ss:$16 sps:$4 sm:$0xff]   ;;  %v2687_v7 = vld [vmem:[#allocation2 + $0xc] ss:$16 sps:$4 sm:$0xff]  }
  0x4c   :  { %231 = vmatprep.subr.bf16.mxu0 %v2675_v1  ;;  %v2680_v4 = vld [vmem:[#allocation2 + $0x20] ss:$16 sps:$4 sm:$0xff]   ;;  %v2681_v5 = vld [vmem:[#allocation2 + $0x44] ss:$16 sps:$4 sm:$0xff]   ;;  %v2689_v8 = vld [vmem:[#allocation2 + $0x8] ss:$16 sps:$4 sm:$0xff]   ;;  %272 = vmatprep.subr.bf16.mxu1 %v2687_v7  ;;  %v127_v1 = vlaneseq }
  0x4d   :  { %232 = vmatpush1.bf16.msra.mxu0 %v2677_v2  ;;  %v2683_v6 = vld [vmem:[#allocation2 + $0x40] ss:$16 sps:$4 sm:$0xff]   ;;  %v2690_v9 = vld [vmem:[#allocation2 + $0x2c] ss:$16 sps:$4 sm:$0xff]   ;;  %v2684_v10 = vld [vmem:[#allocation2 + $0x64] ss:$16 sps:$4 sm:$0xff]   ;;  %273 = vmatpush1.bf16.msra.mxu1 %v2689_v8 }
  0x4e   :  { %233 = vmatprep.subr.bf16.mxu0 %v2678_v3  ;;  %v2692_v11 = vld [vmem:[#allocation2 + $0x28] ss:$16 sps:$4 sm:$0xff]   ;;  %v2686_v12 = vld [vmem:[#allocation2 + $0x60] ss:$16 sps:$4 sm:$0xff]   ;;  %274 = vmatprep.subr.bf16.mxu1 %v2690_v9  ;;  %v2693_v13 = vld [vmem:[#allocation2 + $0x4c] ss:$16 sps:$4 sm:$0xff]  }
  0x4f   :  { %v107_v14 = vld [vmem:[%s3707_s0] sm:$0xff]  ;;  %v2695_v16 = vld [vmem:[#allocation2 + $0x48] ss:$16 sps:$4 sm:$0xff]   ;;  %v2696_v18 = vld [vmem:[#allocation2 + $0x6c] ss:$16 sps:$4 sm:$0xff]   ;;  %v3387_v2 = vshrl.u32 %v127_v1, 7 }
  0x50   :  { %v2701_v15 = vld [vmem:[%s3710_s3 + $0x4] ss:$8 sps:$4 sm:$0xff]   ;;  %v108_v17 = vpack.c.bf16 %v107_v14, %v107_v14  ;;  %v2699_v19 = vld [vmem:[%s3710_s3] ss:$8 sps:$4 sm:$0xff]   ;;  %v2704_v20 = vld [vmem:[%s3710_s3 + $0x14] ss:$8 sps:$4 sm:$0xff]  }
  0x51   :  { %234 = vmatpush1.bf16.msra.mxu0 %v2680_v4  ;;  %275 = vmatpush1.bf16.msra.mxu1 %v2692_v11  ;;  %v2698_v21 = vld [vmem:[#allocation2 + $0x68] ss:$16 sps:$4 sm:$0xff]   ;;  %v2707_v23 = vld [vmem:[%s3710_s3 + $0x24] ss:$8 sps:$4 sm:$0xff]   ;;  %v2710_v25 = vld [vmem:[%s3710_s3 + $0x34] ss:$8 sps:$4 sm:$0xff]  }
  0x52   :  { %235 = vmatprep.subr.bf16.mxu0 %v2681_v5  ;;  %276 = vmatprep.subr.bf16.mxu1 %v2693_v13  ;;  %v2702_v22 = vld [vmem:[%s3710_s3 + $0x10] ss:$8 sps:$4 sm:$0xff]   ;;  %v2705_v24 = vld [vmem:[%s3710_s3 + $0x20] ss:$8 sps:$4 sm:$0xff]   ;;  %v2713_v27 = vld [vmem:[%s3710_s3 + $0x44] ss:$8 sps:$4 sm:$0xff]  }
  0x53   :  { %v2708_v26 = vld [vmem:[%s3710_s3 + $0x30] ss:$8 sps:$4 sm:$0xff]   ;;  %v2711_v28 = vld [vmem:[%s3710_s3 + $0x40] ss:$8 sps:$4 sm:$0xff]   ;;  %v2716_v29 = vld [vmem:[%s3710_s3 + $0x54] ss:$8 sps:$4 sm:$0xff]  }
  0x54   :  { %v2714_v30 = vld [vmem:[%s3710_s3 + $0x50] ss:$8 sps:$4 sm:$0xff]   ;;  %v2719_v31 = vld [vmem:[%s3710_s3 + $0x64] ss:$8 sps:$4 sm:$0xff]   ;;  %v2717_v32 = vld [vmem:[%s3710_s3 + $0x60] ss:$8 sps:$4 sm:$0xff]  }
  0x55   :  { %236 = vmatpush1.bf16.msra.mxu0 %v2683_v6  ;;  %277 = vmatpush1.bf16.msra.mxu1 %v2695_v16  ;;  %v2722_v33 = vld [vmem:[%s3710_s3 + $0x74] ss:$8 sps:$4 sm:$0xff]   ;;  %v2720_v34 = vld [vmem:[%s3710_s3 + $0x70] ss:$8 sps:$4 sm:$0xff]   ;;  %v2725_v35 = vld [vmem:[%s3710_s3 + $0x84] ss:$8 sps:$4 sm:$0xff]  }
  0x56   :  { %237 = vmatprep.subr.bf16.mxu0 %v2684_v10  ;;  %278 = vmatprep.subr.bf16.mxu1 %v2696_v18  ;;  %v2723_v36 = vld [vmem:[%s3710_s3 + $0x80] ss:$8 sps:$4 sm:$0xff]   ;;  %v2728_v37 = vld [vmem:[%s3710_s3 + $0x94] ss:$8 sps:$4 sm:$0xff]   ;;  %v2726_v38 = vld [vmem:[%s3710_s3 + $0x90] ss:$8 sps:$4 sm:$0xff]  }
  0x57   :  { %v2731_v39 = vld [vmem:[%s3710_s3 + $0xa4] ss:$8 sps:$4 sm:$0xff]   ;;  %v2729_v40 = vld [vmem:[%s3710_s3 + $0xa0] ss:$8 sps:$4 sm:$0xff]   ;;  %v2734_v41 = vld [vmem:[%s3710_s3 + $0xb4] ss:$8 sps:$4 sm:$0xff]  }
  0x58   :  { %v2732_v42 = vld [vmem:[%s3710_s3 + $0xb0] ss:$8 sps:$4 sm:$0xff]   ;;  %v2737_v43 = vld [vmem:[%s3710_s3 + $0xc4] ss:$8 sps:$4 sm:$0xff]   ;;  %v2735_v44 = vld [vmem:[%s3710_s3 + $0xc0] ss:$8 sps:$4 sm:$0xff]  }
  0x59   :  { %238 = vmatpush1.bf16.msra.mxu0 %v2686_v12  ;;  %279 = vmatpush1.bf16.msra.mxu1 %v2698_v21  ;;  %v2740_v45 = vld [vmem:[%s3710_s3 + $0xd4] ss:$8 sps:$4 sm:$0xff]   ;;  %v2738_v46 = vld [vmem:[%s3710_s3 + $0xd0] ss:$8 sps:$4 sm:$0xff]   ;;  %v2743_v47 = vld [vmem:[%s3710_s3 + $0xe4] ss:$8 sps:$4 sm:$0xff]  }
  0x5a   :  { %717 = vmatprep.subr.bf16.mxu0 %v2701_v15  ;;  %v2741_v48 = vld [vmem:[%s3710_s3 + $0xe0] ss:$8 sps:$4 sm:$0xff]   ;;  %v2746_v49 = vld [vmem:[%s3710_s3 + $0xf4] ss:$8 sps:$4 sm:$0xff]   ;;  %v2744_v50 = vld [vmem:[%s3710_s3 + $0xf0] ss:$8 sps:$4 sm:$0xff]  }
  0x5b   :  { %v2749_v51 = vld [vmem:[%s3710_s3 + $0x104] ss:$8 sps:$4 sm:$0xff]   ;;  %v2799_v56 = vld [vmem:[#allocation5 + $0x50] sm:$0xff]   ;;  %v2801_v58 = vld [vmem:[#allocation5 + $0x58] sm:$0xff]   ;;  %v3390_v3 = vsub.s32 0, %v3387_v2  ;;  %v3398_v5 = vsub.s32 1, %v3387_v2 }
  0x5c   :  { %2342 = vmatmul.mubr.msk.bf16.vlgmr.msra.gmra.mrb[0].mxu0 %vm227_vm0, %v108_v17  ;;  %2343 = vmatmul.mubr.msk.bf16.vlgmr.msra.gmra.mrb[0].mxu1 %vm227_vm0, %v108_v17  ;;  %v2795_v52 = vld [vmem:[#allocation5 + $0x40] sm:$0xff]   ;;  %v2797_v54 = vld [vmem:[#allocation5 + $0x48] sm:$0xff]   ;;  %v2800_v57 = vld [vmem:[#allocation5 + $0x10] sm:$0xff]   ;;  %v3405_v9 = vsub.s32 3, %v3387_v2  ;;  %vm2307_vm1 = vcmask 1048064  }
  0x5d   :  { %718 = vmatpush1.bf16.msra.mxu0 %v2699_v19  ;;  %v2796_v53 = vld [vmem:[#allocation5] sm:$0xff]   ;;  %2571 = vmatprep.subr.bf16.mxu1 %v2795_v52  ;;  %v2798_v55 = vld [vmem:[#allocation5 + $0x8] sm:$0xff]   ;;  %v2802_v59 = vld [vmem:[#allocation5 + $0x18] sm:$0xff]   ;;  %v3487_v52 = vsub.s32 2, %v3387_v2 }
  0x5e   :  { %719 = vmatprep.subr.bf16.mxu0 %v2704_v20  ;;  %2572 = vmatpush3.bf16.msra.mxu1 %v2796_v53  ;;  %v2803_v60 = vld [vmem:[#allocation5 + $0x60] sm:$0xff]   ;;  %v2805_v62 = vld [vmem:[#allocation5 + $0x68] sm:$0xff]   ;;  %v2788_v53 = vld [vmem:[%s3710_s3 + $0x1d4] ss:$8 sps:$4 sm:$0xff]  }
  0x5f   :  { %2573 = vmatprep.subr.bf16.mxu1 %v2797_v54  ;;  %v2804_v61 = vld [vmem:[#allocation5 + $0x20] sm:$0xff]   ;;  %v2806_v63 = vld [vmem:[#allocation5 + $0x28] sm:$0xff]   ;;  %v2786_v54 = vld [vmem:[%s3710_s3 + $0x1d0] ss:$8 sps:$4 sm:$0xff]  }
  0x60   :  { %v3395_v4 = vld [vmem:[%s3709_s2] sm:$0xf]  ;;  %v2808_v1 = vld [vmem:[#allocation5 + $0x30] sm:$0xff]   ;;  %v2809_v2 = vld [vmem:[#allocation5 + $0x78] sm:$0xff]  }
  0x61   :  { %720 = vmatpush1.bf16.msra.mxu0 %v2702_v22  ;;  %v130_v6 = vrot.slane %v3395_v4, %v3390_v3  ;;  %v134_v7 = vrot.slane %v3395_v4, %v3398_v5  ;;  %v142_v17 = vrot.slane %v3395_v4, %v3405_v9  ;;  %v2747_v19 = vld [vmem:[%s3710_s3 + $0x100] ss:$8 sps:$4 sm:$0xff]   ;;  %v2752_v22 = vld [vmem:[%s3710_s3 + $0x114] ss:$8 sps:$4 sm:$0xff]  }
  0x62   :  { %721 = vmatprep.subr.bf16.mxu0 %v2707_v23  ;;  %2574 = vmatpush3.bf16.msra.mxu1 %v2798_v55  ;;  %v138_v55 = vrot.slane %v3395_v4, %v3487_v52  ;;  %v2810_v4 = vld [vmem:[#allocation5 + $0x38] sm:$0xff]  }
  0x63   :  { %2575 = vmatprep.subr.bf16.mxu1 %v2799_v56  ;;  %v2791_v56 = vld [vmem:[%s3710_s3 + $0x1e4] ss:$8 sps:$4 sm:$0xff]  }
  0x65   :  { %722 = vmatpush1.bf16.msra.mxu0 %v2705_v24 }
  0x66   :  { %723 = vmatprep.subr.bf16.mxu0 %v2710_v25  ;;  %2576 = vmatpush3.bf16.msra.mxu1 %v2800_v57  ;;  %v2789_v57 = vld [vmem:[%s3710_s3 + $0x1e0] ss:$8 sps:$4 sm:$0xff]  }
  0x67   :  { %2577 = vmatprep.subr.bf16.mxu1 %v2801_v58 }
  0x69   :  { %724 = vmatpush1.bf16.msra.mxu0 %v2708_v26 }
  0x6a   :  { %725 = vmatprep.subr.bf16.mxu0 %v2713_v27  ;;  %2578 = vmatpush3.bf16.msra.mxu1 %v2802_v59  ;;  %v2750_v27 = vld [vmem:[%s3710_s3 + $0x110] ss:$8 sps:$4 sm:$0xff]   ;;  %v2794_v59 = vld [vmem:[%s3710_s3 + $0x1f4] ss:$8 sps:$4 sm:$0xff]  }
  0x6b   :  { %2579 = vmatprep.subr.bf16.mxu1 %v2803_v60  ;;  %v2792_v60 = vld [vmem:[%s3710_s3 + $0x1f0] ss:$8 sps:$4 sm:$0xff]  }
  0x6d   :  { %726 = vmatpush1.bf16.msra.mxu0 %v2711_v28 }
  0x6e   :  { %727 = vmatprep.subr.bf16.mxu0 %v2716_v29  ;;  %2580 = vmatpush3.bf16.msra.mxu1 %v2804_v61  ;;  %v2755_v29 = vld [vmem:[%s3710_s3 + $0x124] ss:$8 sps:$4 sm:$0xff]  }
  0x6f   :  { %2581 = vmatprep.subr.bf16.mxu1 %v2805_v62 }
  0x71   :  { %728 = vmatpush1.bf16.msra.mxu0 %v2714_v30 }
  0x72   :  { %729 = vmatprep.subr.bf16.mxu0 %v2719_v31  ;;  %2582 = vmatpush3.bf16.msra.mxu1 %v2806_v63  ;;  %v2753_v31 = vld [vmem:[%s3710_s3 + $0x120] ss:$8 sps:$4 sm:$0xff]   ;;  %v2807_v63 = vld [vmem:[#allocation5 + $0x70] sm:$0xff]  }
  0x73   :  { %2583 = vmatprep.subr.bf16.mxu1 %v2807_v63  ;;  %v2934_v63 = vld [vmem:[#allocation8 + $0x188] ss:$16 sps:$4 sm:$0xff]  }
  0x75   :  { %730 = vmatpush1.bf16.msra.mxu0 %v2717_v32  ;;  %v2758_v32 = vld [vmem:[%s3710_s3 + $0x134] ss:$8 sps:$4 sm:$0xff]  }
  0x76   :  { %731 = vmatprep.subr.bf16.mxu0 %v2722_v33  ;;  %v2756_v33 = vld [vmem:[%s3710_s3 + $0x130] ss:$8 sps:$4 sm:$0xff]   ;;  %2584 = vmatpush3.bf16.msra.mxu1 %v2808_v1  ;;  %v2942_v1 = vld [vmem:[#allocation8 + $0x1ac] ss:$16 sps:$4 sm:$0xff]  }
  0x77   :  { %2585 = vmatprep.subr.bf16.mxu1 %v2809_v2  ;;  %v2940_v2 = vld [vmem:[#allocation8 + $0x1a8] ss:$16 sps:$4 sm:$0xff]  }
  0x79   :  { %732 = vmatpush1.bf16.msra.mxu0 %v2720_v34  ;;  %v2761_v34 = vld [vmem:[%s3710_s3 + $0x144] ss:$8 sps:$4 sm:$0xff]  }
  0x7a   :  { %733 = vmatprep.subr.bf16.mxu0 %v2725_v35  ;;  %v2759_v35 = vld [vmem:[%s3710_s3 + $0x140] ss:$8 sps:$4 sm:$0xff]   ;;  %2586 = vmatpush3.bf16.msra.mxu1 %v2810_v4 }
  0x7d   :  { %734 = vmatpush1.bf16.msra.mxu0 %v2723_v36  ;;  %v2764_v36 = vld [vmem:[%s3710_s3 + $0x154] ss:$8 sps:$4 sm:$0xff]  }
  0x7e   :  { %735 = vmatprep.subr.bf16.mxu0 %v2728_v37  ;;  %v2762_v37 = vld [vmem:[%s3710_s3 + $0x150] ss:$8 sps:$4 sm:$0xff]  }
  0x81   :  { %736 = vmatpush1.bf16.msra.mxu0 %v2726_v38  ;;  %v2767_v38 = vld [vmem:[%s3710_s3 + $0x164] ss:$8 sps:$4 sm:$0xff]  }
  0x82   :  { %737 = vmatprep.subr.bf16.mxu0 %v2731_v39  ;;  %v2765_v39 = vld [vmem:[%s3710_s3 + $0x160] ss:$8 sps:$4 sm:$0xff]  }
  0x85   :  { %738 = vmatpush1.bf16.msra.mxu0 %v2729_v40  ;;  %v2770_v40 = vld [vmem:[%s3710_s3 + $0x174] ss:$8 sps:$4 sm:$0xff]  }
  0x86   :  { %739 = vmatprep.subr.bf16.mxu0 %v2734_v41  ;;  %v2768_v41 = vld [vmem:[%s3710_s3 + $0x170] ss:$8 sps:$4 sm:$0xff]  }
  0x89   :  { %740 = vmatpush1.bf16.msra.mxu0 %v2732_v42  ;;  %v2773_v42 = vld [vmem:[%s3710_s3 + $0x184] ss:$8 sps:$4 sm:$0xff]  }
  0x8a   :  { %741 = vmatprep.subr.bf16.mxu0 %v2737_v43  ;;  %v2771_v43 = vld [vmem:[%s3710_s3 + $0x180] ss:$8 sps:$4 sm:$0xff]  }
  0x8d   :  { %742 = vmatpush1.bf16.msra.mxu0 %v2735_v44  ;;  %v2776_v44 = vld [vmem:[%s3710_s3 + $0x194] ss:$8 sps:$4 sm:$0xff]  }
  0x8e   :  { %743 = vmatprep.subr.bf16.mxu0 %v2740_v45  ;;  %v2774_v45 = vld [vmem:[%s3710_s3 + $0x190] ss:$8 sps:$4 sm:$0xff]  }
  0x91   :  { %744 = vmatpush1.bf16.msra.mxu0 %v2738_v46  ;;  %v2779_v46 = vld [vmem:[%s3710_s3 + $0x1a4] ss:$8 sps:$4 sm:$0xff]  }
  0x92   :  { %745 = vmatprep.subr.bf16.mxu0 %v2743_v47  ;;  %v2777_v47 = vld [vmem:[%s3710_s3 + $0x1a0] ss:$8 sps:$4 sm:$0xff]  }
  0x95   :  { %746 = vmatpush1.bf16.msra.mxu0 %v2741_v48  ;;  %v2782_v48 = vld [vmem:[%s3710_s3 + $0x1b4] ss:$8 sps:$4 sm:$0xff]  }
  0x96   :  { %747 = vmatprep.subr.bf16.mxu0 %v2746_v49  ;;  %v2780_v49 = vld [vmem:[%s3710_s3 + $0x1b0] ss:$8 sps:$4 sm:$0xff]  }
  0x99   :  { %748 = vmatpush1.bf16.msra.mxu0 %v2744_v50  ;;  %v2785_v50 = vld [vmem:[%s3710_s3 + $0x1c4] ss:$8 sps:$4 sm:$0xff]  }
  0x9a   :  { %758 = vmatprep.subr.bf16.mxu0 %v2749_v51  ;;  %v2783_v51 = vld [vmem:[%s3710_s3 + $0x1c0] ss:$8 sps:$4 sm:$0xff]  }
 0x12f   :  { %v265_v8 = vpop.f32.mrb[0].mxu0  ;;  %v3412_v20 = vpop.f32.mrb[0].mxu1 }
 0x130   :  { %v266_v10 = vadd.f32 %v265_v8, %v130_v6  ;;  %v267_v11 = vpop.f32.mrb[1].mxu0  ;;  %v308_v23 = vpop.f32.mrb[1].mxu1  ;;  %v307_v58 = vadd.f32 %v3412_v20, %v138_v55  ;;  %v2813_v6 = vld [vmem:[#allocation7 + $0x4] ss:$16 sps:$4 sm:$0xff]   ;;  %v2811_v20 = vld [vmem:[#allocation7] ss:$16 sps:$4 sm:$0xff]  }
 0x131   :  { %v268_v12 = vadd.f32 %v267_v11, %v134_v7  ;;  %v269_v13 = vpop.f32.mrb[2].mxu0  ;;  %v309_v24 = vadd.f32 %v308_v23, %v142_v17  ;;  %v310_v25 = vpop.f32.mrb[2].mxu1  ;;  %1193 = vmatprep.subr.bf16.mxu1 %v2813_v6  ;;  %v385_v7 = vld [vmem:[%s3711_s4] sm:$0x3]  ;;  %v2910_v55 = vld [vmem:[#allocation8 + $0x108] ss:$16 sps:$4 sm:$0xff]  }
 0x132   :  { %v313_v14 = vmax.f32 %v266_v10, 0.0  ;;  %v270_v15 = vpop.f32.mrb[3].mxu0  ;;  %v311_v26 = vpop.f32.mrb[3].mxu1  ;;  %v315_v61 = vmax.f32 %v307_v58, 0.0  ;;  %v390_v8 = vrot.slane %v385_v7, %v3390_v3  ;;  %v394_v10 = vrot.slane %v385_v7, %v3398_v5  ;;  %v2814_v23 = vld [vmem:[#allocation7 + $0x20] ss:$16 sps:$4 sm:$0xff]  }
 0x133   :  { %v314_v16 = vmax.f32 %v268_v12, 0.0  ;;  %v316_v28 = vmax.f32 %v309_v24, 0.0  ;;  %v2819_v24 = vld [vmem:[#allocation7 + $0x44] ss:$16 sps:$4 sm:$0xff]   ;;  %v2817_v25 = vld [vmem:[#allocation7 + $0x40] ss:$16 sps:$4 sm:$0xff]  }
 0x134   :  { %v317_v21 = vpack.c.bf16 %v313_v14, %v313_v14  ;;  %v319_v62 = vpack.c.bf16 %v315_v61, %v315_v61  ;;  %v2822_v26 = vld [vmem:[#allocation7 + $0x64] ss:$16 sps:$4 sm:$0xff]   ;;  %v2924_v58 = vld [vmem:[#allocation8 + $0x14c] ss:$16 sps:$4 sm:$0xff]   ;;  %v2928_v61 = vld [vmem:[#allocation8 + $0x168] ss:$16 sps:$4 sm:$0xff]  }
 0x135   :  { %v318_v18 = vpack.c.bf16 %v314_v16, %v314_v16  ;;  %v320_v30 = vpack.c.bf16 %v316_v28, %v316_v28  ;;  %v2825_v28 = vld [vmem:[#allocation7 + $0x84] ss:$16 sps:$4 sm:$0xff]   ;;  %v2408_v6 = vld [vmem:[%s3713_s6] ss:$0 sm:$0xff]  ;;  %s3134_s4 = smov [#allocation10]  }
 0x136   :  { %s2315_s6 = sshll.u32 %s3134_s4, 4  ;;  %s2316_s6 = int_to_ptr.vmem [resolvable:$true] %s2315_s6 }
 0x137   :  { %749 = vmatprep.mubr.bf16.mxu0 %v318_v18  ;;  %p3100_p5 = scmp.lt.s32.totalorder %s2316_s6, %s2316_s6 }
 0x138   :  { %750 = vmatmul.mubr.bf16.vlgmr.msra.gmra.mrb[4].mxu0 %v317_v21 }
 0x139   :  { %759 = vmatpush1.bf16.msra.mxu0 %v2747_v19  ;;  %790 = vmatprep.mubr.bf16.mxu0 %v320_v30  ;;  %v2828_v30 = vld [vmem:[#allocation7 + $0xa4] ss:$16 sps:$4 sm:$0xff]  }
 0x13a   :  { %760 = vmatprep.subr.bf16.mxu0 %v2752_v22  ;;  %v2816_v22 = vld [vmem:[#allocation7 + $0x24] ss:$16 sps:$4 sm:$0xff]  }
 0x13d   :  { %761 = vmatpush1.bf16.msra.mxu0 %v2750_v27  ;;  %v2820_v27 = vld [vmem:[#allocation7 + $0x60] ss:$16 sps:$4 sm:$0xff]  }
 0x13e   :  { %762 = vmatprep.subr.bf16.mxu0 %v2755_v29  ;;  %v2823_v29 = vld [vmem:[#allocation7 + $0x80] ss:$16 sps:$4 sm:$0xff]  }
 0x141   :  { %763 = vmatpush1.bf16.msra.mxu0 %v2753_v31  ;;  %v2826_v31 = vld [vmem:[#allocation7 + $0xa0] ss:$16 sps:$4 sm:$0xff]  }
 0x142   :  { %764 = vmatprep.subr.bf16.mxu0 %v2758_v32  ;;  %v2831_v32 = vld [vmem:[#allocation7 + $0xc4] ss:$16 sps:$4 sm:$0xff]  }
 0x145   :  { %765 = vmatpush1.bf16.msra.mxu0 %v2756_v33  ;;  %v2829_v33 = vld [vmem:[#allocation7 + $0xc0] ss:$16 sps:$4 sm:$0xff]  }
 0x146   :  { %766 = vmatprep.subr.bf16.mxu0 %v2761_v34  ;;  %v2834_v34 = vld [vmem:[#allocation7 + $0xe4] ss:$16 sps:$4 sm:$0xff]  }
 0x149   :  { %767 = vmatpush1.bf16.msra.mxu0 %v2759_v35  ;;  %v2832_v35 = vld [vmem:[#allocation7 + $0xe0] ss:$16 sps:$4 sm:$0xff]  }
 0x14a   :  { %768 = vmatprep.subr.bf16.mxu0 %v2764_v36  ;;  %v2837_v36 = vld [vmem:[#allocation7 + $0xc] ss:$16 sps:$4 sm:$0xff]  }
 0x14d   :  { %769 = vmatpush1.bf16.msra.mxu0 %v2762_v37  ;;  %v2862_v37 = vld [vmem:[#allocation8 + $0x8] ss:$16 sps:$4 sm:$0xff]  }
 0x14e   :  { %770 = vmatprep.subr.bf16.mxu0 %v2767_v38  ;;  %v2864_v38 = vld [vmem:[#allocation8 + $0xc] ss:$16 sps:$4 sm:$0xff]  }
 0x151   :  { %771 = vmatpush1.bf16.msra.mxu0 %v2765_v39  ;;  %v2870_v39 = vld [vmem:[#allocation8 + $0x2c] ss:$16 sps:$4 sm:$0xff]  }
 0x152   :  { %772 = vmatprep.subr.bf16.mxu0 %v2770_v40  ;;  %v2868_v40 = vld [vmem:[#allocation8 + $0x28] ss:$16 sps:$4 sm:$0xff]  }
 0x155   :  { %773 = vmatpush1.bf16.msra.mxu0 %v2768_v41  ;;  %v2876_v41 = vld [vmem:[#allocation8 + $0x4c] ss:$16 sps:$4 sm:$0xff]  }
 0x156   :  { %774 = vmatprep.subr.bf16.mxu0 %v2773_v42  ;;  %v2874_v42 = vld [vmem:[#allocation8 + $0x48] ss:$16 sps:$4 sm:$0xff]  }
 0x159   :  { %775 = vmatpush1.bf16.msra.mxu0 %v2771_v43  ;;  %v2882_v43 = vld [vmem:[#allocation8 + $0x6c] ss:$16 sps:$4 sm:$0xff]  }
 0x15a   :  { %776 = vmatprep.subr.bf16.mxu0 %v2776_v44  ;;  %v2880_v44 = vld [vmem:[#allocation8 + $0x68] ss:$16 sps:$4 sm:$0xff]  }
 0x15d   :  { %777 = vmatpush1.bf16.msra.mxu0 %v2774_v45  ;;  %v2888_v45 = vld [vmem:[#allocation8 + $0x8c] ss:$16 sps:$4 sm:$0xff]  }
 0x15e   :  { %778 = vmatprep.subr.bf16.mxu0 %v2779_v46  ;;  %v2886_v46 = vld [vmem:[#allocation8 + $0x88] ss:$16 sps:$4 sm:$0xff]  }
 0x161   :  { %779 = vmatpush1.bf16.msra.mxu0 %v2777_v47  ;;  %v2894_v47 = vld [vmem:[#allocation8 + $0xac] ss:$16 sps:$4 sm:$0xff]  }
 0x162   :  { %780 = vmatprep.subr.bf16.mxu0 %v2782_v48  ;;  %v2892_v48 = vld [vmem:[#allocation8 + $0xa8] ss:$16 sps:$4 sm:$0xff]  }
 0x165   :  { %781 = vmatpush1.bf16.msra.mxu0 %v2780_v49  ;;  %v2900_v49 = vld [vmem:[#allocation8 + $0xcc] ss:$16 sps:$4 sm:$0xff]  }
 0x166   :  { %782 = vmatprep.subr.bf16.mxu0 %v2785_v50  ;;  %v2898_v50 = vld [vmem:[#allocation8 + $0xc8] ss:$16 sps:$4 sm:$0xff]  }
 0x169   :  { %783 = vmatpush1.bf16.msra.mxu0 %v2783_v51  ;;  %v2906_v51 = vld [vmem:[#allocation8 + $0xec] ss:$16 sps:$4 sm:$0xff]  }
 0x16a   :  { %784 = vmatprep.subr.bf16.mxu0 %v2788_v53  ;;  %v2904_v53 = vld [vmem:[#allocation8 + $0xe8] ss:$16 sps:$4 sm:$0xff]  }
 0x16d   :  { %785 = vmatpush1.bf16.msra.mxu0 %v2786_v54  ;;  %v2912_v54 = vld [vmem:[#allocation8 + $0x10c] ss:$16 sps:$4 sm:$0xff]  }
 0x16e   :  { %786 = vmatprep.subr.bf16.mxu0 %v2791_v56  ;;  %v2918_v56 = vld [vmem:[#allocation8 + $0x12c] ss:$16 sps:$4 sm:$0xff]  }
 0x171   :  { %787 = vmatpush1.bf16.msra.mxu0 %v2789_v57  ;;  %v2916_v57 = vld [vmem:[#allocation8 + $0x128] ss:$16 sps:$4 sm:$0xff]  }
 0x172   :  { %788 = vmatprep.subr.bf16.mxu0 %v2794_v59  ;;  %v2922_v59 = vld [vmem:[#allocation8 + $0x148] ss:$16 sps:$4 sm:$0xff]  }
 0x175   :  { %789 = vmatpush1.bf16.msra.mxu0 %v2792_v60  ;;  %v2930_v60 = vld [vmem:[#allocation8 + $0x16c] ss:$16 sps:$4 sm:$0xff]  }
 0x176   :  { %1730 = vmatprep.subr.bf16.mxu0 %v2864_v38  ;;  %v2891_v38 = vld [vmem:[#allocation8 + $0xa4] ss:$16 sps:$4 sm:$0xff]  }
 0x178   :  { %791 = vmatmul.mubr.bf16.vlgmr.msra.gmra.mrb[4].mxu0 %v319_v62  ;;  %v2936_v62 = vld [vmem:[#allocation8 + $0x18c] ss:$16 sps:$4 sm:$0xff]  }
 0x179   :  { %1731 = vmatpush1.bf16.msra.mxu0 %v2862_v37  ;;  %v2883_v37 = vld [vmem:[#allocation8 + $0x80] ss:$16 sps:$4 sm:$0xff]  }
 0x17a   :  { %1732 = vmatprep.subr.bf16.mxu0 %v2870_v39  ;;  %v2889_v39 = vld [vmem:[#allocation8 + $0xa0] ss:$16 sps:$4 sm:$0xff]  }
 0x17d   :  { %1733 = vmatpush1.bf16.msra.mxu0 %v2868_v40  ;;  %v2897_v40 = vld [vmem:[#allocation8 + $0xc4] ss:$16 sps:$4 sm:$0xff]  }
 0x17e   :  { %1734 = vmatprep.subr.bf16.mxu0 %v2876_v41  ;;  %v2895_v41 = vld [vmem:[#allocation8 + $0xc0] ss:$16 sps:$4 sm:$0xff]  }
 0x181   :  { %1735 = vmatpush1.bf16.msra.mxu0 %v2874_v42  ;;  %v2903_v42 = vld [vmem:[#allocation8 + $0xe4] ss:$16 sps:$4 sm:$0xff]  }
 0x182   :  { %1736 = vmatprep.subr.bf16.mxu0 %v2882_v43  ;;  %v2901_v43 = vld [vmem:[#allocation8 + $0xe0] ss:$16 sps:$4 sm:$0xff]  }
 0x185   :  { %1737 = vmatpush1.bf16.msra.mxu0 %v2880_v44  ;;  %v2909_v44 = vld [vmem:[#allocation8 + $0x104] ss:$16 sps:$4 sm:$0xff]  }
 0x186   :  { %1738 = vmatprep.subr.bf16.mxu0 %v2888_v45  ;;  %v2907_v45 = vld [vmem:[#allocation8 + $0x100] ss:$16 sps:$4 sm:$0xff]  }
 0x189   :  { %1739 = vmatpush1.bf16.msra.mxu0 %v2886_v46  ;;  %v2915_v46 = vld [vmem:[#allocation8 + $0x124] ss:$16 sps:$4 sm:$0xff]  }
 0x18a   :  { %1740 = vmatprep.subr.bf16.mxu0 %v2894_v47  ;;  %v2913_v47 = vld [vmem:[#allocation8 + $0x120] ss:$16 sps:$4 sm:$0xff]  }
 0x18d   :  { %1741 = vmatpush1.bf16.msra.mxu0 %v2892_v48  ;;  %v2921_v48 = vld [vmem:[#allocation8 + $0x144] ss:$16 sps:$4 sm:$0xff]  }
 0x18e   :  { %1742 = vmatprep.subr.bf16.mxu0 %v2900_v49  ;;  %v2919_v49 = vld [vmem:[#allocation8 + $0x140] ss:$16 sps:$4 sm:$0xff]  }
 0x191   :  { %1743 = vmatpush1.bf16.msra.mxu0 %v2898_v50  ;;  %v2927_v50 = vld [vmem:[#allocation8 + $0x164] ss:$16 sps:$4 sm:$0xff]  }
 0x192   :  { %1744 = vmatprep.subr.bf16.mxu0 %v2906_v51  ;;  %v2925_v51 = vld [vmem:[#allocation8 + $0x160] ss:$16 sps:$4 sm:$0xff]  }
 0x195   :  { %1745 = vmatpush1.bf16.msra.mxu0 %v2904_v53  ;;  %v2933_v53 = vld [vmem:[#allocation8 + $0x184] ss:$16 sps:$4 sm:$0xff]  }
 0x196   :  { %1746 = vmatprep.subr.bf16.mxu0 %v2912_v54  ;;  %v2931_v54 = vld [vmem:[#allocation8 + $0x180] ss:$16 sps:$4 sm:$0xff]  }
 0x199   :  { %1747 = vmatpush1.bf16.msra.mxu0 %v2910_v55  ;;  %v2939_v55 = vld [vmem:[#allocation8 + $0x1a4] ss:$16 sps:$4 sm:$0xff]  }
 0x19a   :  { %1748 = vmatprep.subr.bf16.mxu0 %v2918_v56  ;;  %v2937_v56 = vld [vmem:[#allocation8 + $0x1a0] ss:$16 sps:$4 sm:$0xff]  }
 0x19d   :  { %1749 = vmatpush1.bf16.msra.mxu0 %v2916_v57  ;;  %v2945_v57 = vld [vmem:[#allocation8 + $0x1c4] ss:$16 sps:$4 sm:$0xff]  }
 0x19e   :  { %1750 = vmatprep.subr.bf16.mxu0 %v2924_v58  ;;  %v2948_v58 = vld [vmem:[#allocation8 + $0x1cc] ss:$16 sps:$4 sm:$0xff]  }
 0x1a1   :  { %1751 = vmatpush1.bf16.msra.mxu0 %v2922_v59  ;;  %v2946_v59 = vld [vmem:[#allocation8 + $0x1c8] ss:$16 sps:$4 sm:$0xff]  }
 0x1a2   :  { %1752 = vmatprep.subr.bf16.mxu0 %v2930_v60  ;;  %v2943_v60 = vld [vmem:[#allocation8 + $0x1c0] ss:$16 sps:$4 sm:$0xff]  }
 0x1a5   :  { %1753 = vmatpush1.bf16.msra.mxu0 %v2928_v61  ;;  %v2951_v61 = vld [vmem:[#allocation8 + $0x1e4] ss:$16 sps:$4 sm:$0xff]  }
 0x1a6   :  { %1754 = vmatprep.subr.bf16.mxu0 %v2936_v62  ;;  %v2954_v62 = vld [vmem:[#allocation8 + $0x1ec] ss:$16 sps:$4 sm:$0xff]  }
 0x1a9   :  { %1755 = vmatpush1.bf16.msra.mxu0 %v2934_v63  ;;  %v2952_v63 = vld [vmem:[#allocation8 + $0x1e8] ss:$16 sps:$4 sm:$0xff]  }
 0x1aa   :  { %1756 = vmatprep.subr.bf16.mxu0 %v2942_v1  ;;  %v2949_v1 = vld [vmem:[#allocation8 + $0x1e0] ss:$16 sps:$4 sm:$0xff]  }
 0x1ad   :  { %1757 = vmatpush1.bf16.msra.mxu0 %v2940_v2  ;;  %v2955_v2 = vld [vmem:[%s3718_s11 + $0x40] sm:$0xff]  }
 0x1ae   :  { %1758 = vmatprep.subr.bf16.mxu0 %v2948_v58 }
 0x1b1   :  { %1759 = vmatpush1.bf16.msra.mxu0 %v2946_v59 }
 0x1b2   :  { %1760 = vmatprep.subr.bf16.mxu0 %v2954_v62 }
 0x1b5   :  { %1761 = vmatpush1.bf16.msra.mxu0 %v2952_v63 }
 0x24b   :  { %v792_v11 = vpop.f32.mrb[4].mxu0 }
 0x24c   :  { %v2659_v12 = vadd.f32 %v792_v11, %v390_v8  ;;  %v794_v13 = vpop.f32.mrb[5].mxu0 }
 0x24d   :  { %v2660_v14 = vadd.f32 %v794_v13, %v394_v10  ;;  %v796_v15 = vpop.f32.mrb[6].mxu0  ;;  %v2835_v13 = vld [vmem:[#allocation7 + $0x8] ss:$16 sps:$4 sm:$0xff]  }
 0x24e   :  { %v799_v16 = vmax.f32 %v2659_v12, 0.0  ;;  %v797_v17 = vpop.f32.mrb[7].mxu0  ;;  %v2840_v15 = vld [vmem:[#allocation7 + $0x2c] ss:$16 sps:$4 sm:$0xff]  }
 0x24f   :  { %v800_v18 = vmax.f32 %v2660_v14, 0.0  ;;  %v2843_v17 = vld [vmem:[#allocation7 + $0x4c] ss:$16 sps:$4 sm:$0xff]  }
 0x250   :  { %v801_v21 = vpack.c.bf16 %v799_v16, %v799_v16  ;;  %v2838_v16 = vld [vmem:[#allocation7 + $0x28] ss:$16 sps:$4 sm:$0xff]  }
 0x251   :  { %v802_v19 = vpack.c.bf16 %v800_v18, %v800_v18  ;;  %v2841_v18 = vld [vmem:[#allocation7 + $0x48] ss:$16 sps:$4 sm:$0xff]  }
 0x253   :  { %970 = vmatprep.mubr.bf16.mxu1 %v802_v19  ;;  %v2846_v19 = vld [vmem:[#allocation7 + $0x6c] ss:$16 sps:$4 sm:$0xff]  }
 0x254   :  { %971 = vmatmul.mubr.bf16.vlgmr.msra.gmra.mrb[4].mxu1 %v801_v21  ;;  %v2849_v21 = vld [vmem:[#allocation7 + $0x8c] ss:$16 sps:$4 sm:$0xff]  }
 0x255   :  { %1194 = vmatpush1.bf16.msra.mxu1 %v2811_v20  ;;  %1225 = vmatprep.mubr.bf16.mxu1 %v3133_v0  ;;  %v2844_v20 = vld [vmem:[#allocation7 + $0x68] ss:$16 sps:$4 sm:$0xff]  }
 0x256   :  { %1195 = vmatprep.subr.bf16.mxu1 %v2816_v22  ;;  %v2847_v22 = vld [vmem:[#allocation7 + $0x88] ss:$16 sps:$4 sm:$0xff]  }
 0x259   :  { %1196 = vmatpush1.bf16.msra.mxu1 %v2814_v23  ;;  %v2852_v23 = vld [vmem:[#allocation7 + $0xac] ss:$16 sps:$4 sm:$0xff]  }
 0x25a   :  { %1197 = vmatprep.subr.bf16.mxu1 %v2819_v24  ;;  %v2850_v24 = vld [vmem:[#allocation7 + $0xa8] ss:$16 sps:$4 sm:$0xff]  }
 0x25d   :  { %1198 = vmatpush1.bf16.msra.mxu1 %v2817_v25  ;;  %v2855_v25 = vld [vmem:[#allocation7 + $0xcc] ss:$16 sps:$4 sm:$0xff]  }
 0x25e   :  { %1199 = vmatprep.subr.bf16.mxu1 %v2822_v26  ;;  %v2858_v26 = vld [vmem:[#allocation7 + $0xec] ss:$16 sps:$4 sm:$0xff]  }
 0x261   :  { %1200 = vmatpush1.bf16.msra.mxu1 %v2820_v27  ;;  %v2856_v27 = vld [vmem:[#allocation7 + $0xe8] ss:$16 sps:$4 sm:$0xff]  }
 0x262   :  { %1201 = vmatprep.subr.bf16.mxu1 %v2825_v28  ;;  %v2861_v28 = vld [vmem:[#allocation8 + $0x4] ss:$16 sps:$4 sm:$0xff]  }
 0x265   :  { %1202 = vmatpush1.bf16.msra.mxu1 %v2823_v29  ;;  %v2859_v29 = vld [vmem:[#allocation8] ss:$16 sps:$4 sm:$0xff]  }
 0x266   :  { %1203 = vmatprep.subr.bf16.mxu1 %v2828_v30  ;;  %v2867_v30 = vld [vmem:[#allocation8 + $0x24] ss:$16 sps:$4 sm:$0xff]  }
 0x269   :  { %1204 = vmatpush1.bf16.msra.mxu1 %v2826_v31  ;;  %v2865_v31 = vld [vmem:[#allocation8 + $0x20] ss:$16 sps:$4 sm:$0xff]  }
 0x26a   :  { %1205 = vmatprep.subr.bf16.mxu1 %v2831_v32  ;;  %v2873_v32 = vld [vmem:[#allocation8 + $0x44] ss:$16 sps:$4 sm:$0xff]  }
 0x26d   :  { %1206 = vmatpush1.bf16.msra.mxu1 %v2829_v33  ;;  %v2871_v33 = vld [vmem:[#allocation8 + $0x40] ss:$16 sps:$4 sm:$0xff]  }
 0x26e   :  { %1207 = vmatprep.subr.bf16.mxu1 %v2834_v34  ;;  %v2879_v34 = vld [vmem:[#allocation8 + $0x64] ss:$16 sps:$4 sm:$0xff]  }
 0x271   :  { %1208 = vmatpush1.bf16.msra.mxu1 %v2832_v35  ;;  %v2877_v35 = vld [vmem:[#allocation8 + $0x60] ss:$16 sps:$4 sm:$0xff]  }
 0x272   :  { %1234 = vmatprep.subr.bf16.mxu1 %v2837_v36  ;;  %v2885_v36 = vld [vmem:[#allocation8 + $0x84] ss:$16 sps:$4 sm:$0xff]  }
 0x327   :  { %v2587_v4 = vpop.f32.mrb[4].mxu1 }
 0x328   :  { %v2588_v7 = vpop.f32.mrb[5].mxu1 }
 0x329   :  { %v2589_v8 = vadd.f32 %v2588_v7, %v2587_v4  ;;  %v2590_v10 = vpop.f32.mrb[6].mxu1  ;;  %v2957_v4 = vld [vmem:[%s3718_s11 + $0xc0] sm:$0xff]  }
 0x32a   :  { %v2591_v11 = vpop.f32.mrb[7].mxu1  ;;  %2615 = vmatprep.subr.bf16.mxu0 %v2957_v4 }
 0x32b   :  { %v973_v12 = vadd.f32 %v2589_v8, %v2408_v6  ;;  %v3529_v6 = vld [vmem:[%s3715_s8] sm:$0xf] }
 0x32c   :  { %v1016_v7 = vrot.slane %v3529_v6, %v3390_v3  ;;  %v1020_v8 = vrot.slane %v3529_v6, %v3398_v5 }
 0x32d   :  { %v978_v14 = vpack.c.bf16 %v973_v12, %v973_v12 }
 0x32f   :  { %1226 = vmatmul.mubr.bf16.vlgmr.msra.gmra.mrb[8].mxu1 %v978_v14 }
 0x330   :  { %1235 = vmatpush1.bf16.msra.mxu1 %v2835_v13  ;;  %1266 = vmatprep.mubr.bf16.mxu1 %v3133_v0  ;;  %v2853_v0 = vld [vmem:[#allocation7 + $0xc8] ss:$16 sps:$4 sm:$0xff]  }
 0x331   :  { %1236 = vmatprep.subr.bf16.mxu1 %v2840_v15 }
 0x334   :  { %1237 = vmatpush1.bf16.msra.mxu1 %v2838_v16 }
 0x335   :  { %1238 = vmatprep.subr.bf16.mxu1 %v2843_v17 }
 0x338   :  { %1239 = vmatpush1.bf16.msra.mxu1 %v2841_v18 }
 0x339   :  { %1240 = vmatprep.subr.bf16.mxu1 %v2846_v19  ;;  %v2956_v19 = vld [vmem:[%s3718_s11] sm:$0xff]  }
 0x33c   :  { %1241 = vmatpush1.bf16.msra.mxu1 %v2844_v20  ;;  %v2958_v20 = vld [vmem:[%s3718_s11 + $0x80] sm:$0xff]  }
 0x33d   :  { %1242 = vmatprep.subr.bf16.mxu1 %v2849_v21 }
 0x340   :  { %1243 = vmatpush1.bf16.msra.mxu1 %v2847_v22  ;;  %v2959_v22 = vld [vmem:[%s3718_s11 + $0x48] sm:$0xff]  }
 0x341   :  { %1244 = vmatprep.subr.bf16.mxu1 %v2852_v23  ;;  %v2961_v23 = vld [vmem:[%s3718_s11 + $0xc8] sm:$0xff]  }
 0x344   :  { %1245 = vmatpush1.bf16.msra.mxu1 %v2850_v24  ;;  %v2960_v24 = vld [vmem:[%s3718_s11 + $0x8] sm:$0xff]  }
 0x345   :  { %1246 = vmatprep.subr.bf16.mxu1 %v2855_v25  ;;  %v2962_v25 = vld [vmem:[%s3718_s11 + $0x88] sm:$0xff]  }
 0x348   :  { %1247 = vmatpush1.bf16.msra.mxu1 %v2853_v0  ;;  %v2963_v0 = vld [vmem:[%s3718_s11 + $0x50] sm:$0xff]  }
 0x349   :  { %1248 = vmatprep.subr.bf16.mxu1 %v2858_v26  ;;  %v2965_v26 = vld [vmem:[%s3718_s11 + $0xd0] sm:$0xff]  }
 0x34c   :  { %1249 = vmatpush1.bf16.msra.mxu1 %v2856_v27  ;;  %v2964_v27 = vld [vmem:[%s3718_s11 + $0x10] sm:$0xff]  }
 0x34d   :  { %1689 = vmatprep.subr.bf16.mxu1 %v2861_v28  ;;  %v2966_v28 = vld [vmem:[%s3718_s11 + $0x90] sm:$0xff]  }
 0x34f   :  { %1267 = vmatmul.mubr.bf16.vlgmr.msra.gmra.mrb[12].mxu1 %v978_v14 }
 0x350   :  { %1690 = vmatpush1.bf16.msra.mxu1 %v2859_v29  ;;  %v2967_v29 = vld [vmem:[%s3718_s11 + $0x58] sm:$0xff]  }
 0x351   :  { %1691 = vmatprep.subr.bf16.mxu1 %v2867_v30  ;;  %v2969_v30 = vld [vmem:[%s3718_s11 + $0xd8] sm:$0xff]  }
 0x354   :  { %1692 = vmatpush1.bf16.msra.mxu1 %v2865_v31  ;;  %v2968_v31 = vld [vmem:[%s3718_s11 + $0x18] sm:$0xff]  }
 0x355   :  { %1693 = vmatprep.subr.bf16.mxu1 %v2873_v32  ;;  %v2970_v32 = vld [vmem:[%s3718_s11 + $0x98] sm:$0xff]  }
 0x358   :  { %1694 = vmatpush1.bf16.msra.mxu1 %v2871_v33  ;;  %v2971_v33 = vld [vmem:[%s3718_s11 + $0x60] sm:$0xff]  }
 0x359   :  { %1695 = vmatprep.subr.bf16.mxu1 %v2879_v34  ;;  %v2973_v34 = vld [vmem:[%s3718_s11 + $0xe0] sm:$0xff]  }
 0x35c   :  { %1696 = vmatpush1.bf16.msra.mxu1 %v2877_v35  ;;  %v2972_v35 = vld [vmem:[%s3718_s11 + $0x20] sm:$0xff]  }
 0x35d   :  { %1697 = vmatprep.subr.bf16.mxu1 %v2885_v36  ;;  %v2974_v36 = vld [vmem:[%s3718_s11 + $0xa0] sm:$0xff]  }
 0x360   :  { %1698 = vmatpush1.bf16.msra.mxu1 %v2883_v37  ;;  %v2975_v37 = vld [vmem:[%s3718_s11 + $0x68] sm:$0xff]  }
 0x361   :  { %1699 = vmatprep.subr.bf16.mxu1 %v2891_v38  ;;  %v2977_v38 = vld [vmem:[%s3718_s11 + $0xe8] sm:$0xff]  }
 0x364   :  { %1700 = vmatpush1.bf16.msra.mxu1 %v2889_v39  ;;  %v2976_v39 = vld [vmem:[%s3718_s11 + $0x28] sm:$0xff]  }
 0x365   :  { %1701 = vmatprep.subr.bf16.mxu1 %v2897_v40  ;;  %v2978_v40 = vld [vmem:[%s3718_s11 + $0xa8] sm:$0xff]  }
 0x368   :  { %1702 = vmatpush1.bf16.msra.mxu1 %v2895_v41 }
 0x369   :  { %1703 = vmatprep.subr.bf16.mxu1 %v2903_v42 }
 0x36c   :  { %1704 = vmatpush1.bf16.msra.mxu1 %v2901_v43 }
 0x36d   :  { %1705 = vmatprep.subr.bf16.mxu1 %v2909_v44 }
 0x370   :  { %1706 = vmatpush1.bf16.msra.mxu1 %v2907_v45  ;;  %v2979_v45 = vld [vmem:[%s3718_s11 + $0x70] sm:$0xff]  }
 0x371   :  { %1707 = vmatprep.subr.bf16.mxu1 %v2915_v46  ;;  %v2980_v46 = vld [vmem:[%s3718_s11 + $0x30] sm:$0xff]  }
 0x374   :  { %1708 = vmatpush1.bf16.msra.mxu1 %v2913_v47  ;;  %v2981_v47 = vld [vmem:[%s3718_s11 + $0xf0] sm:$0xff]  }
 0x375   :  { %1709 = vmatprep.subr.bf16.mxu1 %v2921_v48  ;;  %v2982_v48 = vld [vmem:[%s3718_s11 + $0xb0] sm:$0xff]  }
 0x378   :  { %1710 = vmatpush1.bf16.msra.mxu1 %v2919_v49  ;;  %v2983_v49 = vld [vmem:[%s3718_s11 + $0x78] sm:$0xff]  }
 0x379   :  { %1711 = vmatprep.subr.bf16.mxu1 %v2927_v50  ;;  %v2984_v50 = vld [vmem:[%s3718_s11 + $0x38] sm:$0xff]  }
 0x37c   :  { %1712 = vmatpush1.bf16.msra.mxu1 %v2925_v51  ;;  %v2985_v51 = vld [vmem:[%s3718_s11 + $0xf8] sm:$0xff]  }
 0x37d   :  { %1713 = vmatprep.subr.bf16.mxu1 %v2933_v53  ;;  %v2986_v53 = vld [vmem:[%s3718_s11 + $0xb8] sm:$0xff]  }
 0x380   :  { %1714 = vmatpush1.bf16.msra.mxu1 %v2931_v54  ;;  %v2987_v54 = vld [vmem:[%s3720_s13 + $0x40] sm:$0xff]  }
 0x381   :  { %1715 = vmatprep.subr.bf16.mxu1 %v2939_v55  ;;  %v1347_v55 = vld [vmem:[%s3717_s10] sm:$0xf] }
 0x382   :  { %v1360_v58 = vrot.slane %v1347_v55, %v3487_v52  ;;  %v1356_v59 = vrot.slane %v1347_v55, %v3398_v5 }
 0x384   :  { %1716 = vmatpush1.bf16.msra.mxu1 %v2937_v56  ;;  %v1028_v56 = vrot.slane %v3529_v6, %v3405_v9 }
 0x385   :  { %1717 = vmatprep.subr.bf16.mxu1 %v2945_v57  ;;  %v1352_v57 = vrot.slane %v1347_v55, %v3390_v3 }
 0x388   :  { %1718 = vmatpush1.bf16.msra.mxu1 %v2943_v60  ;;  %v1364_v60 = vrot.slane %v1347_v55, %v3405_v9 }
 0x389   :  { %1719 = vmatprep.subr.bf16.mxu1 %v2951_v61 }
 0x38c   :  { %1720 = vmatpush1.bf16.msra.mxu1 %v2949_v1 }
 0x38d   :  { %2593 = vmatprep.subr.bf16.mxu1 %v2955_v2 }
 0x402   :  { %v1227_v10 = vpop.f32.mrb[8].mxu1 }
 0x403   :  { %v1228_v11 = vadd.f32 %v1227_v10, %v1016_v7  ;;  %v1229_v12 = vpop.f32.mrb[9].mxu1 }
 0x404   :  { %v1230_v13 = vadd.f32 %v1229_v12, %v1020_v8  ;;  %v1231_v14 = vpop.f32.mrb[10].mxu1 }
 0x405   :  { %v1275_v15 = vmax.f32 %v1228_v11, 0.0  ;;  %v1232_v16 = vpop.f32.mrb[11].mxu1 }
 0x406   :  { %v1276_v17 = vmax.f32 %v1230_v13, 0.0 }
 0x407   :  { %v1279_v21 = vpack.c.bf16 %v1275_v15, %v1275_v15 }
 0x408   :  { %v1280_v18 = vpack.c.bf16 %v1276_v17, %v1276_v17 }
 0x40a   :  { %1721 = vmatprep.mubr.bf16.mxu1 %v1280_v18  ;;  %1762 = vmatprep.mubr.bf16.mxu0 %v1280_v18 }
 0x40b   :  { %1722 = vmatmul.mubr.bf16.vlgmr.msra.gmra.mrb[16].mxu1 %v1279_v21  ;;  %1763 = vmatmul.mubr.bf16.vlgmr.msra.gmra.mrb[8].mxu0 %v1279_v21 }
 0x40c   :  { %2594 = vmatpush3.bf16.msra.mxu1 %v2956_v19  ;;  %2616 = vmatpush3.bf16.msra.mxu0 %v2958_v20  ;;  %v2988_v19 = vld [vmem:[%s3720_s13] sm:$0xff]  }
 0x40d   :  { %2595 = vmatprep.subr.bf16.mxu1 %v2959_v22  ;;  %2617 = vmatprep.subr.bf16.mxu0 %v2961_v23  ;;  %v2989_v22 = vld [vmem:[%s3720_s13 + $0x48] sm:$0xff]  }
 0x410   :  { %2596 = vmatpush3.bf16.msra.mxu1 %v2960_v24  ;;  %2618 = vmatpush3.bf16.msra.mxu0 %v2962_v25  ;;  %v2990_v24 = vld [vmem:[%s3720_s13 + $0x8] sm:$0xff]   ;;  %v2991_v25 = vld [vmem:[%s3720_s13 + $0x50] sm:$0xff]  }
 0x411   :  { %2597 = vmatprep.subr.bf16.mxu1 %v2963_v0  ;;  %2619 = vmatprep.subr.bf16.mxu0 %v2965_v26  ;;  %v2992_v0 = vld [vmem:[%s3720_s13 + $0x10] sm:$0xff]   ;;  %v2993_v26 = vld [vmem:[%s3720_s13 + $0x58] sm:$0xff]  }
 0x414   :  { %2598 = vmatpush3.bf16.msra.mxu1 %v2964_v27  ;;  %2620 = vmatpush3.bf16.msra.mxu0 %v2966_v28  ;;  %v2994_v27 = vld [vmem:[%s3720_s13 + $0x18] sm:$0xff]   ;;  %v2995_v28 = vld [vmem:[%s3720_s13 + $0x60] sm:$0xff]  }
 0x415   :  { %2599 = vmatprep.subr.bf16.mxu1 %v2967_v29  ;;  %2621 = vmatprep.subr.bf16.mxu0 %v2969_v30  ;;  %v2996_v29 = vld [vmem:[%s3720_s13 + $0x20] sm:$0xff]   ;;  %v2997_v30 = vld [vmem:[%s3720_s13 + $0x68] sm:$0xff]  }
 0x418   :  { %2600 = vmatpush3.bf16.msra.mxu1 %v2968_v31  ;;  %2622 = vmatpush3.bf16.msra.mxu0 %v2970_v32  ;;  %v2998_v31 = vld [vmem:[%s3720_s13 + $0x28] sm:$0xff]   ;;  %v1024_v32 = vrot.slane %v3529_v6, %v3487_v52  ;;  %v3002_v52 = vld [vmem:[%s3720_s13 + $0x38] sm:$0xff]  }
 0x419   :  { %2601 = vmatprep.subr.bf16.mxu1 %v2971_v33  ;;  %2623 = vmatprep.subr.bf16.mxu0 %v2973_v34  ;;  %v2999_v33 = vld [vmem:[%s3720_s13 + $0x70] sm:$0xff]  }
 0x41a   :  { %v3000_v34 = vld [vmem:[%s3720_s13 + $0x30] sm:$0xff]  }
 0x41c   :  { %2602 = vmatpush3.bf16.msra.mxu1 %v2972_v35  ;;  %2624 = vmatpush3.bf16.msra.mxu0 %v2974_v36  ;;  %v3001_v36 = vld [vmem:[%s3720_s13 + $0x78] sm:$0xff]  }
 0x41d   :  { %2603 = vmatprep.subr.bf16.mxu1 %v2975_v37  ;;  %2625 = vmatprep.subr.bf16.mxu0 %v2977_v38 }
 0x420   :  { %2604 = vmatpush3.bf16.msra.mxu1 %v2976_v39  ;;  %2626 = vmatpush3.bf16.msra.mxu0 %v2978_v40  ;;  %v2521_v40 = vld [vmem:[%s3719_s12] ss:$0 sm:$0xff]  ;;  %s3724_s12 = smov 64  }
 0x421   :  { %2605 = vmatprep.subr.bf16.mxu1 %v2979_v45  ;;  %2627 = vmatprep.subr.bf16.mxu0 %v2981_v47 }
 0x422   :  { %v3601_v41 = vpop.f32.mrb[12].mxu1 }
 0x423   :  { %v1270_v42 = vpop.f32.mrb[13].mxu1  ;;  %v1269_v35 = vadd.f32 %v3601_v41, %v1024_v32 }
 0x424   :  { %v1272_v43 = vpop.f32.mrb[14].mxu1  ;;  %2606 = vmatpush3.bf16.msra.mxu1 %v2980_v46  ;;  %2628 = vmatpush3.bf16.msra.mxu0 %v2982_v48  ;;  %v1271_v61 = vadd.f32 %v1270_v42, %v1028_v56 }
 0x425   :  { %v1273_v44 = vpop.f32.mrb[15].mxu1  ;;  %2607 = vmatprep.subr.bf16.mxu1 %v2983_v49  ;;  %2629 = vmatprep.subr.bf16.mxu0 %v2985_v51  ;;  %v1277_v6 = vmax.f32 %v1269_v35, 0.0 }
 0x426   :  { %v1278_v16 = vmax.f32 %v1271_v61, 0.0 }
 0x427   :  { %v1281_v37 = vpack.c.bf16 %v1277_v6, %v1277_v6 }
 0x428   :  { %2608 = vmatpush3.bf16.msra.mxu1 %v2984_v50  ;;  %2630 = vmatpush3.bf16.msra.mxu0 %v2986_v53  ;;  %v1282_v23 = vpack.c.bf16 %v1278_v16, %v1278_v16  ;;  %v2554_v53 = vld [vmem:[%s3721_s14] ss:$0 sm:$0xff]  ;;  %s3095_s14 = scalar_lea.vmem %s2316_s6, 128 }
 0x429   :  { %2637 = vmatprep.subr.bf16.mxu1 %v2987_v54  ;;  %p3096_p4 = scmp.ne.s32.totalorder %s2316_s6, %s3095_s14  ;;  %p3101_p6 = scmp.lt.s32.totalorder %s3095_s14, %s3095_s14 }
 0x42b   :  { %p3102_p7 = por %p3101_p6, %p3100_p5 }
 0x42d   :  { %p3103_p8 = pnand %p3102_p7, %p3096_p4 }
 0x4de   :  { %v1723_v62 = vpop.f32.mrb[16].mxu1  ;;  %v1764_v63 = vpop.f32.mrb[8].mxu0 }
 0x4df   :  { %v1724_v1 = vadd.f32 %v1723_v62, %v1352_v57  ;;  %v1765_v2 = vadd.f32 %v1764_v63, %v1360_v58  ;;  %v1725_v4 = vpop.f32.mrb[17].mxu1  ;;  %v1766_v7 = vpop.f32.mrb[9].mxu0 }
 0x4e0   :  { %v1726_v8 = vadd.f32 %v1725_v4, %v1356_v59  ;;  %v1767_v10 = vadd.f32 %v1766_v7, %v1364_v60  ;;  %v1727_v11 = vpop.f32.mrb[18].mxu1  ;;  %v1768_v12 = vpop.f32.mrb[10].mxu0 }
 0x4e1   :  { %v1771_v13 = vmax.f32 %v1724_v1, 0.0  ;;  %v1773_v14 = vmax.f32 %v1765_v2, 0.0  ;;  %v1728_v3 = vpop.f32.mrb[19].mxu1  ;;  %v1769_v15 = vpop.f32.mrb[11].mxu0 }
 0x4e2   :  { %v1772_v17 = vmax.f32 %v1726_v8, 0.0  ;;  %v1774_v5 = vmax.f32 %v1767_v10, 0.0 }
 0x4e3   :  { %v1775_v20 = vpack.c.bf16 %v1771_v13, %v1771_v13  ;;  %v1777_v21 = vpack.c.bf16 %v1773_v14, %v1773_v14 }
 0x4e4   :  { %v1776_v18 = vpack.c.bf16 %v1772_v17, %v1772_v17  ;;  %v1778_v9 = vpack.c.bf16 %v1774_v5, %v1774_v5 }
 0x4e6   :  { %2074 = vmatprep.mubr.bf16.mxu1 %v1776_v18  ;;  %2114 = vmatprep.mubr.bf16.mxu0 %v1778_v9 }
 0x4e7   :  { %2075 = vmatmul.mubr.bf16.vlgmr.msra.gmra.mrb[20].mxu1 %v1775_v20  ;;  %2115 = vmatmul.mubr.bf16.vlgmr.msra.gmra.mrb[12].mxu0 %v1777_v21 }
 0x4e8   :  { %2638 = vmatpush3.bf16.msra.mxu1 %v2988_v19  ;;  %2289 = vmatprep.mubr.bf16.mxu1 %v1282_v23 }
 0x4e9   :  { %2639 = vmatprep.subr.bf16.mxu1 %v2989_v22 }
 0x4ec   :  { %2640 = vmatpush3.bf16.msra.mxu1 %v2990_v24 }
 0x4ed   :  { %2641 = vmatprep.subr.bf16.mxu1 %v2991_v25 }
 0x4f0   :  { %2642 = vmatpush3.bf16.msra.mxu1 %v2992_v0 }
 0x4f1   :  { %2643 = vmatprep.subr.bf16.mxu1 %v2993_v26 }
 0x4f4   :  { %2644 = vmatpush3.bf16.msra.mxu1 %v2994_v27 }
 0x4f5   :  { %2645 = vmatprep.subr.bf16.mxu1 %v2995_v28 }
 0x4f8   :  { %2646 = vmatpush3.bf16.msra.mxu1 %v2996_v29 }
 0x4f9   :  { %2647 = vmatprep.subr.bf16.mxu1 %v2997_v30 }
 0x4fc   :  { %2648 = vmatpush3.bf16.msra.mxu1 %v2998_v31 }
 0x4fd   :  { %2649 = vmatprep.subr.bf16.mxu1 %v2999_v33 }
 0x500   :  { %2650 = vmatpush3.bf16.msra.mxu1 %v3000_v34 }
 0x501   :  { %2651 = vmatprep.subr.bf16.mxu1 %v3001_v36 }
 0x504   :  { %2652 = vmatpush3.bf16.msra.mxu1 %v3002_v52 }
 0x507   :  { %2290 = vmatmul.mubr.bf16.vlgmr.msra.gmra.mrb[24].mxu1 %v1281_v37 }
 0x5ba   :  { %v2609_v38 = vpop.f32.mrb[20].mxu1  ;;  %v2631_v39 = vpop.f32.mrb[12].mxu0 }
 0x5bb   :  { %v2610_v41 = vpop.f32.mrb[21].mxu1  ;;  %v2632_v42 = vpop.f32.mrb[13].mxu0 }
 0x5bc   :  { %v2611_v43 = vadd.f32 %v2610_v41, %v2609_v38  ;;  %v2633_v44 = vadd.f32 %v2632_v42, %v2631_v39  ;;  %v2612_v45 = vpop.f32.mrb[22].mxu1  ;;  %v2634_v46 = vpop.f32.mrb[14].mxu0 }
 0x5bd   :  { %v2613_v47 = vpop.f32.mrb[23].mxu1  ;;  %v2635_v48 = vpop.f32.mrb[15].mxu0 }
 0x5be   :  { %v2077_v49 = vadd.f32 %v2611_v43, %v2521_v40 }
 0x5c0   :  { %v2117_v50 = vadd.f32 %v2633_v44, %v2077_v49 }
 0x5c2   :  { %2302 = vst.msk [vmem:[#allocation10] sm:$0xff] %vm227_vm0, %v2117_v50 }
 0x5da   :  { %v2653_v51 = vpop.f32.mrb[24].mxu1 }
 0x5db   :  { %v2654_v54 = vpop.f32.mrb[25].mxu1 }
 0x5dc   :  { %v2655_v55 = vadd.f32 %v2654_v54, %v2653_v51  ;;  %v2656_v56 = vpop.f32.mrb[26].mxu1 }
 0x5dd   :  { %v2657_v57 = vpop.f32.mrb[27].mxu1 }
 0x5de   :  { %v2292_v58 = vadd.f32 %v2655_v55, %v2554_v53 }
 0x5e0   :  { %v2297_v59 = vsub.f32 0.0, %v2292_v58 }
 0x5e2   :  { %v2298_v60 = vmul.f32 1.442695, %v2297_v59 }
 0x5e4   :  { %3003 = vpow2.f32 %v2298_v60 }
 0x5ee   :  { %v3004_v61 = vpop.eup %3003 }
 0x5ef   :  { %v2300_v62 = vadd.f32 1.0, %v3004_v61 }
 0x5f1   :  { %3005 = vrcp.f32 %v2300_v62 }
 0x5fb   :  { %v3006_v63 = vpop.eup %3005 }
 0x5fc   :  { %2304 = vrot.lane.b32.xlu0 %v3006_v63, %s3724_s12 }
 0x66e   :  { %v2305_v1 = vpop.permute.xlu0 %2304 }
 0x66f   :  { %2308 = vst.msk [vmem:[#allocation10] sm:$0xff] %vm2307_vm1, %v2305_v1 }
 0x670   :  { %3106 = shalt.err (!%p3103_p8)
}
 0x671   :  { %s3107_s28 = scalar_lea.hbm %s3722_s15, 128 }
 0x672   :  { %p3108_p9 = scmp.ne.s32.totalorder %s3722_s15, %s3107_s28  ;;  %p3111_p10 = scmp.lt.u32.totalorder %s3107_s28, %s3722_s15 }
 0x674   :  { %p3113_p11 = pnand %p3111_p10, %p3108_p9 }
 0x676   :  { %3116 = shalt.err (!%p3113_p11)
}
 0x677   :  { %2318 = dma.vmem_to_hbm [thread:$0]  %s2316_s6, 128, %s3722_s15, [#allocation4]  }
 0x678   :  { %3123 = dma.done.wait [#allocation4], 128  }
 0x679   :  { %3124 = vsyncadd [#allocation4], 4294967168 }
 0x67a   :  { %2322 = vsyncpa [#allocation3], 1 }
 0x67b   :  { %2323 = vsyncpa [#allocation6], 1 }
 0x67c   :  { %2324 = vsyncpa [#allocation9], 1 }
 0x67d   :  { %2325 = vsyncpa [#allocation4], 1 }

</bundles_post_ra>
